<compile_context>
chip_gen: v6e
topology: v6e:2x2x1
jax: 0.10.0
libtpu: 0.0.40
codegen_flags: <defaults>
</compile_context>

<pallas_src>
import jax
import jax.numpy as jnp
import numpy as np
from jax import lax
from jax.experimental import pallas as pl
from jax.experimental.pallas import tpu as pltpu


# ---------------------------------------------------------------------------
# Static sizes / packed-constants layout. Row offsets of the blocks read on the
# hot path are multiples of 8 (sublane-tile aligned). The lane-packing scheme
# hard-requires 4 * D == 128 (one vreg lane width).
# ---------------------------------------------------------------------------
_D = 32            # LSTM hidden size (args.down_dim)
_G = 4 * _D        # 128: the four gates fill exactly one vreg lane-wise
_H = 200           # decoder hidden size
_HP = 256          # decoder hidden padded to two full lane tiles

_ROW_W1 = 0                    # rows [  0,128): W1 zero-padded to (G, HP)
_ROW_B1 = _G                   # row   128    : b1 zero-padded; lane HP-1 = 1.0 sentinel
_ROW_W2 = _G + 1               # row   129    : W2^T zero-padded; lane HP-1 = b2
_ROW_W = _G + 8                # rows [136,168): bilinear W (D, D) at lanes [0, D)
_ROW_WIH = _ROW_W + _D         # rows [168,200): weight_ih^T (0.5-folded) at lanes [0, G)
_ROW_BIAS = _ROW_WIH + _D      # row   200    : bias_ih + bias_hh (0.5-folded) at lanes [0, G)
_NROWS = _ROW_BIAS + 8         # 208


# ----------------------------- fused Pallas kernel ------------------------------


def _fused_kernel(mask_ref, x_ref, resp_ref, whh_ref, c_ref, o_ref):
    """Fused LSTM-last-hidden + length mask + bilinear/MLP head.

    mask_ref: VMEM (B, 1) f32     1.0 where dial_length == T else 0.0
    x_ref   : VMEM (B, T, D)      dials (batch-first)
    resp_ref: VMEM (B, 1, D)      response
    whh_ref : VMEM (G, G)         [0.5-folded weight_hh_l0^T ; 0] (zero rows annihilate the
                                  don't-care upper lanes of the 128-lane h carry)
    c_ref   : VMEM (208, 256)     packed constants (W1p, b1p, w2row, W, wih, bias), see layout
    o_ref   : VMEM (B, 1)         sigmoid output
    """
    B, T, D = x_ref.shape
    G = 4 * D
    assert D == _D and G == _G, "lane-packing scheme assumes 4*D == 128"

    # --- unpack the hoisted (one-time) constants: load full-lane rows, value-slice lanes ---
    wih = c_ref[_ROW_WIH:_ROW_WIH + D, :][:, 0:G]          # (D, G)  0.5-folded
    bias = c_ref[_ROW_BIAS:_ROW_BIAS + 1, :][:, 0:G]       # (1, G)  0.5-folded

    # ---- hoisted input projection: one (B*T, D) @ (D, 4D) matmul + bias for all steps ----
    x_flat = x_ref[...].reshape(B * T, D)
    gates_x = (jnp.dot(x_flat, wih, preferred_element_type=jnp.float32)
               + bias).reshape(B, T, G)

    # Hoisted lane constants for the single-tanh activation. i/f/o gate inputs were pre-scaled
    # by 0.5 at param-prep time, so sigmoid(x) = 0.5 * tanh(x/2) + 0.5 becomes one FMA; the
    # g-gate lanes keep tanh(gates) unchanged (scale 1, offset 0).
    lane = lax.broadcasted_iota(jnp.int32, (B, G), 1)
    g_block = jnp.logical_and(lane >= 2 * D, lane < 3 * D)
    a_scale = jnp.where(g_block, 1.0, 0.5)
    a_off = jnp.where(g_block, 0.0, 0.5)

    # Recurrent state carried in registers. Real h/c live in lanes [0, D); the remaining lanes
    # hold bounded don't-care values that are annihilated by the zero rows of whh.
    h_full = jnp.zeros((B, G), jnp.float32)
    c_full = jnp.zeros((B, G), jnp.float32)

    # T is small & static: fully unrolled straight-line recurrence.
    for t in range(T):
        # whh_ref is indexed per step (not hoisted as a value) so the 16-vreg weight is not
        # pinned across the whole unrolled loop.
        gates = gates_x[:, t, :] + jnp.dot(h_full, whh_ref[...],
                                           preferred_element_type=jnp.float32)
        act = jnp.tanh(gates) * a_scale + a_off       # single EUP pass for all four gates
        # PyTorch gate order along lanes: [i | f | g | o]; rolls (XLU) align each to lanes [0,D).
        i_g = act
        f_g = pltpu.roll(act, shift=3 * D, axis=1)
        g_g = pltpu.roll(act, shift=2 * D, axis=1)
        o_g = pltpu.roll(act, shift=1 * D, axis=1)
        c_full = f_g * c_full + i_g * g_g
        h_full = o_g * jnp.tanh(c_full)

    # pack/pad + outp_l[:, -1, :] semantics: zero rows whose length != T (mask from wrapper).
    h = h_full[:, 0:D] * mask_ref[...]                                     # (B, D)

    # ---- head: hW = h @ W, rep = [hW, r, |hW-r|, hW*r], MLP with 256-lane padded decoder ----
    W_bil = c_ref[_ROW_W:_ROW_W + D, :][:, 0:D]                            # (D, D)
    hW = jnp.dot(h, W_bil, preferred_element_type=jnp.float32)             # (B, D)
    r = resp_ref[:, 0, :]                                                  # (B, D)
    rep = jnp.concatenate([hW, r, jnp.abs(hW - r), hW * r], axis=1)        # (B, 4D)

    w1 = c_ref[_ROW_W1:_ROW_W1 + G, :]                                     # (G, HP)
    b1 = c_ref[_ROW_B1:_ROW_B1 + 1, :]                                     # (1, HP)
    w2 = c_ref[_ROW_W2:_ROW_W2 + 1, :]                                     # (1, HP)
    z = jnp.maximum(jnp.dot(rep, w1, preferred_element_type=jnp.float32) + b1, 0.0)
    # Padding lanes of z are exactly 0; sentinel lane HP-1 is exactly 1.0, so the reduce picks
    # up b2 via w2[HP-1] and the result equals z[:, :200] @ W2 + b2 bit-for-bit up to reassoc.
    y = jnp.sum(z * w2, axis=1, keepdims=True)
    o_ref[...] = jax.nn.sigmoid(y)


# ------------------------------ wrappers ------------------------------------

_VMEM = pl.BlockSpec(memory_space=pltpu.MemorySpace.VMEM)


def prepare_params(params):
    """One-time parameter preparation (runs once, OUTSIDE the per-call jit)."""
    w_ih_t, w_hh_t, bias, W, W1, b1, W2, b2 = params
    D = w_ih_t.shape[0]
    G = 4 * D
    assert D == _D and G == _G == 128, "lane-packing scheme assumes 4*D == 128"
    H = W1.shape[1]
    assert H == _H and _HP >= H

    # Fold the 0.5 pre-scale of the sigmoid-as-tanh rewrite into the i/f/o gate columns of
    # w_ih^T / w_hh^T AND the i/f/o lanes of the bias (g columns [2D,3D) untouched).
    col = np.arange(G)
    ifo = (col < 2 * D) | (col >= 3 * D)
    gscale = jnp.asarray(np.where(ifo, 0.5, 1.0), jnp.float32)[None, :]
    w_ih_f = (w_ih_t * gscale).astype(jnp.float32)
    w_hh_f = (w_hh_t * gscale).astype(jnp.float32)
    bias_f = (bias * gscale).astype(jnp.float32)

    # Zero-pad W_hh^T to (G, G) so h is carried as a full 128-lane register (don't-care upper
    # lanes are annihilated by the zero rows).
    whh_pad = jnp.zeros((G, G), jnp.float32).at[:D, :].set(w_hh_f)

    # Decoder padded from H=200 to 256 lanes (zero cols/rows -> bit-compatible), plus the
    # sentinel lane that carries the output bias b2 through the final reduce.
    W1p = jnp.zeros((G, _HP), jnp.float32).at[:, :H].set(W1)
    b1p = jnp.zeros((_HP,), jnp.float32).at[:H].set(b1[0]).at[_HP - 1].set(1.0)
    w2row = jnp.zeros((_HP,), jnp.float32).at[:H].set(W2[:, 0]).at[_HP - 1].set(b2[0, 0])

    # Pack all remaining constants into ONE contiguous VMEM buffer (1 DMA instead of 7).
    consts = jnp.zeros((_NROWS, _HP), jnp.float32)
    consts = consts.at[_ROW_W1:_ROW_W1 + G, :].set(W1p)
    consts = consts.at[_ROW_B1, :].set(b1p)
    consts = consts.at[_ROW_W2, :].set(w2row)
    consts = consts.at[_ROW_W:_ROW_W + D, :D].set(W)
    consts = consts.at[_ROW_WIH:_ROW_WIH + D, :G].set(w_ih_f)
    consts = consts.at[_ROW_BIAS, :G].set(bias_f[0])

    return whh_pad, consts


@jax.jit
def transition_predictor_is_forward(dials, dial_length, response, prepared):
    """dials: (B, T, D) f32, dial_length: (B,) i32, response: (B, 1, D) f32 -> (B, 1) f32."""
    whh_pad, consts = prepared
    B, T, D = dials.shape
    assert D == _D and 4 * D == 128

    # Length mask computed here (one vectorized compare) instead of a per-row SMEM loop.
    mask = (dial_length == T).astype(jnp.float32).reshape(B, 1)

    # Note: for production batch sizes, add a grid over B (B-tile a multiple of 8 sublanes) with
    # dimension_semantics=("parallel",) and constant index_maps on the weight BlockSpecs so both
    # v7x TensorCores split the batch while weights stay VMEM-resident; re-derive the VMEM budget
    # against v7x's 64 MiB. At B=2 a single gridless call is latency-optimal.
    return pl.pallas_call(
        _fused_kernel,
        out_shape=jax.ShapeDtypeStruct((B, 1), jnp.float32),
        in_specs=[_VMEM] * 5,
        out_specs=_VMEM,
    )(mask, dials, response, whh_pad, consts)


# ---------------------------- pure-JAX reference ----------------------------


def _reference_forward(dials, dial_length, response, params):
    w_ih_t, w_hh_t, bias, W, W1, b1, W2, b2 = params
    B, T, D = dials.shape

    def cell(carry, x_t):
        h, c = carry
        gates = x_t @ w_ih_t + h @ w_hh_t + bias
        i = jax.nn.sigmoid(gates[:, :D])
        f = jax.nn.sigmoid(gates[:, D: 2 * D])
        g = jnp.tanh(gates[:, 2 * D: 3 * D])
        o = jax.nn.sigmoid(gates[:, 3 * D:])
        c = f * c + i * g
        h = o * jnp.tanh(c)
        return (h, c), None

    init = (jnp.zeros((B, D), jnp.float32), jnp.zeros((B, D), jnp.float32))
    (h, _), _ = lax.scan(cell, init, jnp.transpose(dials, (1, 0, 2)))
    h = h * (dial_length == T).astype(jnp.float32)[:, None]
    hr = h @ W
    r = response[:, 0, :]
    rep = jnp.concatenate([hr, r, jnp.abs(hr - r), hr * r], axis=1)
    z = jnp.maximum(rep @ W1 + b1, 0.0)
    return jax.nn.sigmoid(z @ W2 + b2)


# --------------------------------- main --------------------------------------

if __name__ == "__main__":
    # Small config: args.downsample=True, args.down_dim=32  ->  dim = 32
    B, T, D, H = 2, 8, 32, 200

    key = jax.random.PRNGKey(0)
    keys = jax.random.split(key, 12)

    # Deterministic synthetic parameters (shapes follow the module's __init__).
    scale = 1.0 / np.sqrt(D)
    w_ih_t = jax.random.normal(keys[0], (D, 4 * D), jnp.float32) * scale   # weight_ih_l0^T
    w_hh_t = jax.random.normal(keys[1], (D, 4 * D), jnp.float32) * scale   # weight_hh_l0^T
    bias = jax.random.normal(keys[2], (1, 4 * D), jnp.float32) * scale     # bias_ih + bias_hh
    W = jax.random.normal(keys[3], (D, D), jnp.float32) * np.sqrt(2.0 / (D + D))   # xavier-ish
    W1 = jax.random.normal(keys[4], (4 * D, H), jnp.float32) * (1.0 / np.sqrt(4 * D))
    b1 = jax.random.normal(keys[5], (1, H), jnp.float32) * 0.01
    W2 = jax.random.normal(keys[6], (H, 1), jnp.float32) * (1.0 / np.sqrt(H))
    b2 = jax.random.normal(keys[7], (1, 1), jnp.float32) * 0.01
    params = (w_ih_t, w_hh_t, bias, W, W1, b1, W2, b2)

    # One-time parameter preparation (0.5 folding, whh zero-pad, decoder padding, packing).
    prepared = jax.tree_util.tree_map(jax.block_until_ready, prepare_params(params))

    # Deterministic inputs.
    dials = jax.random.normal(keys[8], (B, T, D), jnp.float32)
    response = jax.random.normal(keys[9], (B, 1, D), jnp.float32)
    dial_length = jnp.array([T, T - 3], dtype=jnp.int32)  # second sequence is shorter -> masked

    out = transition_predictor_is_forward(dials, dial_length, response, prepared)
    out = jax.block_until_ready(out)

    ref = _reference_forward(dials, dial_length, response, params)
    ref = jax.block_until_ready(ref)

    assert out.shape == (B, 1), out.shape
    np.testing.assert_allclose(np.asarray(out), np.asarray(ref), rtol=1e-3, atol=2e-3)

    print("KERNEL_OK")
</pallas_src>

<mosaic_0001>
module attributes {stable_mosaic.version = 11 : i64} {
  func.func @_fused_kernel(%arg0: memref<2x1xf32, #tpu.memory_space<vmem>>, %arg1: memref<2x8x32xf32, #tpu.memory_space<vmem>>, %arg2: memref<2x1x32xf32, #tpu.memory_space<vmem>>, %arg3: memref<128x128xf32, #tpu.memory_space<vmem>>, %arg4: memref<208x256xf32, #tpu.memory_space<vmem>>, %arg5: memref<2x1xf32, #tpu.memory_space<vmem>>) attributes {dimension_semantics = [], scalar_prefetch = 0 : i64, scratch_operands = 0 : i64, tpu.core_type = #tpu.core_type<tc>} {
    %c168 = arith.constant 168 : index
    %c0 = arith.constant 0 : index
    %0 = vector.load %arg4[%c168, %c0] : memref<208x256xf32, #tpu.memory_space<vmem>>, vector<32x256xf32>
    %1 = vector.extract_strided_slice %0 {offsets = [0, 0], sizes = [32, 128], strides = [1, 1]} : vector<32x256xf32> to vector<32x128xf32>
    %c200 = arith.constant 200 : index
    %c0_0 = arith.constant 0 : index
    %2 = vector.load %arg4[%c200, %c0_0] : memref<208x256xf32, #tpu.memory_space<vmem>>, vector<1x256xf32>
    %3 = vector.extract_strided_slice %2 {offsets = [0, 0], sizes = [1, 128], strides = [1, 1]} : vector<1x256xf32> to vector<1x128xf32>
    %c0_1 = arith.constant 0 : index
    %c0_2 = arith.constant 0 : index
    %c0_3 = arith.constant 0 : index
    %4 = vector.load %arg1[%c0_1, %c0_2, %c0_3] : memref<2x8x32xf32, #tpu.memory_space<vmem>>, vector<2x8x32xf32>
    %5 = vector.shape_cast %4 : vector<2x8x32xf32> to vector<16x32xf32>
    %cst = arith.constant dense<0.000000e+00> : vector<16x128xf32>
    %6 = tpu.matmul %5, %1, %cst {dimension_numbers = #tpu.dot_dimension_numbers<[1], [0], [0], [1], [0, 0, 1, 1], [], []>} : vector<16x32xf32>, vector<32x128xf32>, vector<16x128xf32> -> vector<16x128xf32>
    %7 = vector.broadcast %3 : vector<1x128xf32> to vector<16x128xf32>
    %8 = arith.addf %6, %7 : vector<16x128xf32>
    %9 = vector.shape_cast %8 : vector<16x128xf32> to vector<2x8x128xf32>
    %10 = tpu.iota {dimensions = array<i32: 1>} : vector<2x128xi32>
    %c64_i32 = arith.constant 64 : i32
    %11 = vector.broadcast %c64_i32 : i32 to vector<2x128xi32>
    %12 = arith.cmpi sge, %10, %11 : vector<2x128xi32>
    %c96_i32 = arith.constant 96 : i32
    %13 = vector.broadcast %c96_i32 : i32 to vector<2x128xi32>
    %14 = arith.cmpi slt, %10, %13 : vector<2x128xi32>
    %15 = arith.andi %12, %14 : vector<2x128xi1>
    %cst_4 = arith.constant 1.000000e+00 : f32
    %cst_5 = arith.constant 5.000000e-01 : f32
    %16 = vector.broadcast %cst_4 : f32 to vector<2x128xf32>
    %17 = vector.broadcast %cst_5 : f32 to vector<2x128xf32>
    %18 = arith.select %15, %16, %17 : vector<2x128xi1>, vector<2x128xf32>
    %cst_6 = arith.constant 0.000000e+00 : f32
    %cst_7 = arith.constant 5.000000e-01 : f32
    %19 = vector.broadcast %cst_6 : f32 to vector<2x128xf32>
    %20 = vector.broadcast %cst_7 : f32 to vector<2x128xf32>
    %21 = arith.select %15, %19, %20 : vector<2x128xi1>, vector<2x128xf32>
    %cst_8 = arith.constant 0.000000e+00 : f32
    %22 = vector.broadcast %cst_8 : f32 to vector<2x128xf32>
    %cst_9 = arith.constant 0.000000e+00 : f32
    %23 = vector.broadcast %cst_9 : f32 to vector<2x128xf32>
    %24 = vector.extract_strided_slice %9 {offsets = [0, 0, 0], sizes = [2, 1, 128], strides = [1, 1, 1]} : vector<2x8x128xf32> to vector<2x1x128xf32>
    %25 = vector.shape_cast %24 : vector<2x1x128xf32> to vector<2x128xf32>
    %c0_10 = arith.constant 0 : index
    %c0_11 = arith.constant 0 : index
    %26 = vector.load %arg3[%c0_10, %c0_11] : memref<128x128xf32, #tpu.memory_space<vmem>>, vector<128x128xf32>
    %cst_12 = arith.constant dense<0.000000e+00> : vector<2x128xf32>
    %27 = tpu.matmul %22, %26, %cst_12 {dimension_numbers = #tpu.dot_dimension_numbers<[1], [0], [0], [1], [0, 0, 1, 1], [], []>} : vector<2x128xf32>, vector<128x128xf32>, vector<2x128xf32> -> vector<2x128xf32>
    %28 = arith.addf %25, %27 : vector<2x128xf32>
    %29 = math.tanh %28 : vector<2x128xf32>
    %30 = arith.mulf %29, %18 : vector<2x128xf32>
    %31 = arith.addf %30, %21 : vector<2x128xf32>
    %c96_i32_13 = arith.constant 96 : i32
    %32 = tpu.dynamic_rotate %31 by %c96_i32_13 dim 1 : vector<2x128xf32>, i32 -> vector<2x128xf32>
    %c64_i32_14 = arith.constant 64 : i32
    %33 = tpu.dynamic_rotate %31 by %c64_i32_14 dim 1 : vector<2x128xf32>, i32 -> vector<2x128xf32>
    %c32_i32 = arith.constant 32 : i32
    %34 = tpu.dynamic_rotate %31 by %c32_i32 dim 1 : vector<2x128xf32>, i32 -> vector<2x128xf32>
    %35 = arith.mulf %32, %23 : vector<2x128xf32>
    %36 = arith.mulf %31, %33 : vector<2x128xf32>
    %37 = arith.addf %35, %36 : vector<2x128xf32>
    %38 = math.tanh %37 : vector<2x128xf32>
    %39 = arith.mulf %34, %38 : vector<2x128xf32>
    %40 = vector.extract_strided_slice %9 {offsets = [0, 1, 0], sizes = [2, 1, 128], strides = [1, 1, 1]} : vector<2x8x128xf32> to vector<2x1x128xf32>
    %41 = vector.shape_cast %40 : vector<2x1x128xf32> to vector<2x128xf32>
    %c0_15 = arith.constant 0 : index
    %c0_16 = arith.constant 0 : index
    %42 = vector.load %arg3[%c0_15, %c0_16] : memref<128x128xf32, #tpu.memory_space<vmem>>, vector<128x128xf32>
    %cst_17 = arith.constant dense<0.000000e+00> : vector<2x128xf32>
    %43 = tpu.matmul %39, %42, %cst_17 {dimension_numbers = #tpu.dot_dimension_numbers<[1], [0], [0], [1], [0, 0, 1, 1], [], []>} : vector<2x128xf32>, vector<128x128xf32>, vector<2x128xf32> -> vector<2x128xf32>
    %44 = arith.addf %41, %43 : vector<2x128xf32>
    %45 = math.tanh %44 : vector<2x128xf32>
    %46 = arith.mulf %45, %18 : vector<2x128xf32>
    %47 = arith.addf %46, %21 : vector<2x128xf32>
    %c96_i32_18 = arith.constant 96 : i32
    %48 = tpu.dynamic_rotate %47 by %c96_i32_18 dim 1 : vector<2x128xf32>, i32 -> vector<2x128xf32>
    %c64_i32_19 = arith.constant 64 : i32
    %49 = tpu.dynamic_rotate %47 by %c64_i32_19 dim 1 : vector<2x128xf32>, i32 -> vector<2x128xf32>
    %c32_i32_20 = arith.constant 32 : i32
    %50 = tpu.dynamic_rotate %47 by %c32_i32_20 dim 1 : vector<2x128xf32>, i32 -> vector<2x128xf32>
    %51 = arith.mulf %48, %37 : vector<2x128xf32>
    %52 = arith.mulf %47, %49 : vector<2x128xf32>
    %53 = arith.addf %51, %52 : vector<2x128xf32>
    %54 = math.tanh %53 : vector<2x128xf32>
    %55 = arith.mulf %50, %54 : vector<2x128xf32>
    %56 = vector.extract_strided_slice %9 {offsets = [0, 2, 0], sizes = [2, 1, 128], strides = [1, 1, 1]} : vector<2x8x128xf32> to vector<2x1x128xf32>
    %57 = vector.shape_cast %56 : vector<2x1x128xf32> to vector<2x128xf32>
    %c0_21 = arith.constant 0 : index
    %c0_22 = arith.constant 0 : index
    %58 = vector.load %arg3[%c0_21, %c0_22] : memref<128x128xf32, #tpu.memory_space<vmem>>, vector<128x128xf32>
    %cst_23 = arith.constant dense<0.000000e+00> : vector<2x128xf32>
    %59 = tpu.matmul %55, %58, %cst_23 {dimension_numbers = #tpu.dot_dimension_numbers<[1], [0], [0], [1], [0, 0, 1, 1], [], []>} : vector<2x128xf32>, vector<128x128xf32>, vector<2x128xf32> -> vector<2x128xf32>
    %60 = arith.addf %57, %59 : vector<2x128xf32>
    %61 = math.tanh %60 : vector<2x128xf32>
    %62 = arith.mulf %61, %18 : vector<2x128xf32>
    %63 = arith.addf %62, %21 : vector<2x128xf32>
    %c96_i32_24 = arith.constant 96 : i32
    %64 = tpu.dynamic_rotate %63 by %c96_i32_24 dim 1 : vector<2x128xf32>, i32 -> vector<2x128xf32>
    %c64_i32_25 = arith.constant 64 : i32
    %65 = tpu.dynamic_rotate %63 by %c64_i32_25 dim 1 : vector<2x128xf32>, i32 -> vector<2x128xf32>
    %c32_i32_26 = arith.constant 32 : i32
    %66 = tpu.dynamic_rotate %63 by %c32_i32_26 dim 1 : vector<2x128xf32>, i32 -> vector<2x128xf32>
    %67 = arith.mulf %64, %53 : vector<2x128xf32>
    %68 = arith.mulf %63, %65 : vector<2x128xf32>
    %69 = arith.addf %67, %68 : vector<2x128xf32>
    %70 = math.tanh %69 : vector<2x128xf32>
    %71 = arith.mulf %66, %70 : vector<2x128xf32>
    %72 = vector.extract_strided_slice %9 {offsets = [0, 3, 0], sizes = [2, 1, 128], strides = [1, 1, 1]} : vector<2x8x128xf32> to vector<2x1x128xf32>
    %73 = vector.shape_cast %72 : vector<2x1x128xf32> to vector<2x128xf32>
    %c0_27 = arith.constant 0 : index
    %c0_28 = arith.constant 0 : index
    %74 = vector.load %arg3[%c0_27, %c0_28] : memref<128x128xf32, #tpu.memory_space<vmem>>, vector<128x128xf32>
    %cst_29 = arith.constant dense<0.000000e+00> : vector<2x128xf32>
    %75 = tpu.matmul %71, %74, %cst_29 {dimension_numbers = #tpu.dot_dimension_numbers<[1], [0], [0], [1], [0, 0, 1, 1], [], []>} : vector<2x128xf32>, vector<128x128xf32>, vector<2x128xf32> -> vector<2x128xf32>
    %76 = arith.addf %73, %75 : vector<2x128xf32>
    %77 = math.tanh %76 : vector<2x128xf32>
    %78 = arith.mulf %77, %18 : vector<2x128xf32>
    %79 = arith.addf %78, %21 : vector<2x128xf32>
    %c96_i32_30 = arith.constant 96 : i32
    %80 = tpu.dynamic_rotate %79 by %c96_i32_30 dim 1 : vector<2x128xf32>, i32 -> vector<2x128xf32>
    %c64_i32_31 = arith.constant 64 : i32
    %81 = tpu.dynamic_rotate %79 by %c64_i32_31 dim 1 : vector<2x128xf32>, i32 -> vector<2x128xf32>
    %c32_i32_32 = arith.constant 32 : i32
    %82 = tpu.dynamic_rotate %79 by %c32_i32_32 dim 1 : vector<2x128xf32>, i32 -> vector<2x128xf32>
    %83 = arith.mulf %80, %69 : vector<2x128xf32>
    %84 = arith.mulf %79, %81 : vector<2x128xf32>
    %85 = arith.addf %83, %84 : vector<2x128xf32>
    %86 = math.tanh %85 : vector<2x128xf32>
    %87 = arith.mulf %82, %86 : vector<2x128xf32>
    %88 = vector.extract_strided_slice %9 {offsets = [0, 4, 0], sizes = [2, 1, 128], strides = [1, 1, 1]} : vector<2x8x128xf32> to vector<2x1x128xf32>
    %89 = vector.shape_cast %88 : vector<2x1x128xf32> to vector<2x128xf32>
    %c0_33 = arith.constant 0 : index
    %c0_34 = arith.constant 0 : index
    %90 = vector.load %arg3[%c0_33, %c0_34] : memref<128x128xf32, #tpu.memory_space<vmem>>, vector<128x128xf32>
    %cst_35 = arith.constant dense<0.000000e+00> : vector<2x128xf32>
    %91 = tpu.matmul %87, %90, %cst_35 {dimension_numbers = #tpu.dot_dimension_numbers<[1], [0], [0], [1], [0, 0, 1, 1], [], []>} : vector<2x128xf32>, vector<128x128xf32>, vector<2x128xf32> -> vector<2x128xf32>
    %92 = arith.addf %89, %91 : vector<2x128xf32>
    %93 = math.tanh %92 : vector<2x128xf32>
    %94 = arith.mulf %93, %18 : vector<2x128xf32>
    %95 = arith.addf %94, %21 : vector<2x128xf32>
    %c96_i32_36 = arith.constant 96 : i32
    %96 = tpu.dynamic_rotate %95 by %c96_i32_36 dim 1 : vector<2x128xf32>, i32 -> vector<2x128xf32>
    %c64_i32_37 = arith.constant 64 : i32
    %97 = tpu.dynamic_rotate %95 by %c64_i32_37 dim 1 : vector<2x128xf32>, i32 -> vector<2x128xf32>
    %c32_i32_38 = arith.constant 32 : i32
    %98 = tpu.dynamic_rotate %95 by %c32_i32_38 dim 1 : vector<2x128xf32>, i32 -> vector<2x128xf32>
    %99 = arith.mulf %96, %85 : vector<2x128xf32>
    %100 = arith.mulf %95, %97 : vector<2x128xf32>
    %101 = arith.addf %99, %100 : vector<2x128xf32>
    %102 = math.tanh %101 : vector<2x128xf32>
    %103 = arith.mulf %98, %102 : vector<2x128xf32>
    %104 = vector.extract_strided_slice %9 {offsets = [0, 5, 0], sizes = [2, 1, 128], strides = [1, 1, 1]} : vector<2x8x128xf32> to vector<2x1x128xf32>
    %105 = vector.shape_cast %104 : vector<2x1x128xf32> to vector<2x128xf32>
    %c0_39 = arith.constant 0 : index
    %c0_40 = arith.constant 0 : index
    %106 = vector.load %arg3[%c0_39, %c0_40] : memref<128x128xf32, #tpu.memory_space<vmem>>, vector<128x128xf32>
    %cst_41 = arith.constant dense<0.000000e+00> : vector<2x128xf32>
    %107 = tpu.matmul %103, %106, %cst_41 {dimension_numbers = #tpu.dot_dimension_numbers<[1], [0], [0], [1], [0, 0, 1, 1], [], []>} : vector<2x128xf32>, vector<128x128xf32>, vector<2x128xf32> -> vector<2x128xf32>
    %108 = arith.addf %105, %107 : vector<2x128xf32>
    %109 = math.tanh %108 : vector<2x128xf32>
    %110 = arith.mulf %109, %18 : vector<2x128xf32>
    %111 = arith.addf %110, %21 : vector<2x128xf32>
    %c96_i32_42 = arith.constant 96 : i32
    %112 = tpu.dynamic_rotate %111 by %c96_i32_42 dim 1 : vector<2x128xf32>, i32 -> vector<2x128xf32>
    %c64_i32_43 = arith.constant 64 : i32
    %113 = tpu.dynamic_rotate %111 by %c64_i32_43 dim 1 : vector<2x128xf32>, i32 -> vector<2x128xf32>
    %c32_i32_44 = arith.constant 32 : i32
    %114 = tpu.dynamic_rotate %111 by %c32_i32_44 dim 1 : vector<2x128xf32>, i32 -> vector<2x128xf32>
    %115 = arith.mulf %112, %101 : vector<2x128xf32>
    %116 = arith.mulf %111, %113 : vector<2x128xf32>
    %117 = arith.addf %115, %116 : vector<2x128xf32>
    %118 = math.tanh %117 : vector<2x128xf32>
    %119 = arith.mulf %114, %118 : vector<2x128xf32>
    %120 = vector.extract_strided_slice %9 {offsets = [0, 6, 0], sizes = [2, 1, 128], strides = [1, 1, 1]} : vector<2x8x128xf32> to vector<2x1x128xf32>
    %121 = vector.shape_cast %120 : vector<2x1x128xf32> to vector<2x128xf32>
    %c0_45 = arith.constant 0 : index
    %c0_46 = arith.constant 0 : index
    %122 = vector.load %arg3[%c0_45, %c0_46] : memref<128x128xf32, #tpu.memory_space<vmem>>, vector<128x128xf32>
    %cst_47 = arith.constant dense<0.000000e+00> : vector<2x128xf32>
    %123 = tpu.matmul %119, %122, %cst_47 {dimension_numbers = #tpu.dot_dimension_numbers<[1], [0], [0], [1], [0, 0, 1, 1], [], []>} : vector<2x128xf32>, vector<128x128xf32>, vector<2x128xf32> -> vector<2x128xf32>
    %124 = arith.addf %121, %123 : vector<2x128xf32>
    %125 = math.tanh %124 : vector<2x128xf32>
    %126 = arith.mulf %125, %18 : vector<2x128xf32>
    %127 = arith.addf %126, %21 : vector<2x128xf32>
    %c96_i32_48 = arith.constant 96 : i32
    %128 = tpu.dynamic_rotate %127 by %c96_i32_48 dim 1 : vector<2x128xf32>, i32 -> vector<2x128xf32>
    %c64_i32_49 = arith.constant 64 : i32
    %129 = tpu.dynamic_rotate %127 by %c64_i32_49 dim 1 : vector<2x128xf32>, i32 -> vector<2x128xf32>
    %c32_i32_50 = arith.constant 32 : i32
    %130 = tpu.dynamic_rotate %127 by %c32_i32_50 dim 1 : vector<2x128xf32>, i32 -> vector<2x128xf32>
    %131 = arith.mulf %128, %117 : vector<2x128xf32>
    %132 = arith.mulf %127, %129 : vector<2x128xf32>
    %133 = arith.addf %131, %132 : vector<2x128xf32>
    %134 = math.tanh %133 : vector<2x128xf32>
    %135 = arith.mulf %130, %134 : vector<2x128xf32>
    %136 = vector.extract_strided_slice %9 {offsets = [0, 7, 0], sizes = [2, 1, 128], strides = [1, 1, 1]} : vector<2x8x128xf32> to vector<2x1x128xf32>
    %137 = vector.shape_cast %136 : vector<2x1x128xf32> to vector<2x128xf32>
    %c0_51 = arith.constant 0 : index
    %c0_52 = arith.constant 0 : index
    %138 = vector.load %arg3[%c0_51, %c0_52] : memref<128x128xf32, #tpu.memory_space<vmem>>, vector<128x128xf32>
    %cst_53 = arith.constant dense<0.000000e+00> : vector<2x128xf32>
    %139 = tpu.matmul %135, %138, %cst_53 {dimension_numbers = #tpu.dot_dimension_numbers<[1], [0], [0], [1], [0, 0, 1, 1], [], []>} : vector<2x128xf32>, vector<128x128xf32>, vector<2x128xf32> -> vector<2x128xf32>
    %140 = arith.addf %137, %139 : vector<2x128xf32>
    %141 = math.tanh %140 : vector<2x128xf32>
    %142 = arith.mulf %141, %18 : vector<2x128xf32>
    %143 = arith.addf %142, %21 : vector<2x128xf32>
    %c96_i32_54 = arith.constant 96 : i32
    %144 = tpu.dynamic_rotate %143 by %c96_i32_54 dim 1 : vector<2x128xf32>, i32 -> vector<2x128xf32>
    %c64_i32_55 = arith.constant 64 : i32
    %145 = tpu.dynamic_rotate %143 by %c64_i32_55 dim 1 : vector<2x128xf32>, i32 -> vector<2x128xf32>
    %c32_i32_56 = arith.constant 32 : i32
    %146 = tpu.dynamic_rotate %143 by %c32_i32_56 dim 1 : vector<2x128xf32>, i32 -> vector<2x128xf32>
    %147 = arith.mulf %144, %133 : vector<2x128xf32>
    %148 = arith.mulf %143, %145 : vector<2x128xf32>
    %149 = arith.addf %147, %148 : vector<2x128xf32>
    %150 = math.tanh %149 : vector<2x128xf32>
    %151 = arith.mulf %146, %150 : vector<2x128xf32>
    %152 = vector.extract_strided_slice %151 {offsets = [0, 0], sizes = [2, 32], strides = [1, 1]} : vector<2x128xf32> to vector<2x32xf32>
    %c0_57 = arith.constant 0 : index
    %c0_58 = arith.constant 0 : index
    %153 = vector.load %arg0[%c0_57, %c0_58] : memref<2x1xf32, #tpu.memory_space<vmem>>, vector<2x1xf32>
    %154 = vector.broadcast %153 : vector<2x1xf32> to vector<2x32xf32>
    %155 = arith.mulf %152, %154 : vector<2x32xf32>
    %c136 = arith.constant 136 : index
    %c0_59 = arith.constant 0 : index
    %156 = vector.load %arg4[%c136, %c0_59] : memref<208x256xf32, #tpu.memory_space<vmem>>, vector<32x256xf32>
    %157 = vector.extract_strided_slice %156 {offsets = [0, 0], sizes = [32, 32], strides = [1, 1]} : vector<32x256xf32> to vector<32x32xf32>
    %cst_60 = arith.constant dense<0.000000e+00> : vector<2x32xf32>
    %158 = tpu.matmul %155, %157, %cst_60 {dimension_numbers = #tpu.dot_dimension_numbers<[1], [0], [0], [1], [0, 0, 1, 1], [], []>} : vector<2x32xf32>, vector<32x32xf32>, vector<2x32xf32> -> vector<2x32xf32>
    %c0_61 = arith.constant 0 : index
    %c0_62 = arith.constant 0 : index
    %c0_63 = arith.constant 0 : index
    %159 = vector.load %arg2[%c0_61, %c0_62, %c0_63] : memref<2x1x32xf32, #tpu.memory_space<vmem>>, vector<2x1x32xf32>
    %160 = vector.shape_cast %159 : vector<2x1x32xf32> to vector<2x32xf32>
    %161 = arith.subf %158, %160 : vector<2x32xf32>
    %162 = math.absf %161 : vector<2x32xf32>
    %163 = arith.mulf %158, %160 : vector<2x32xf32>
    %164 = tpu.concatenate %158, %160, %162, %163 in 1 : vector<2x32xf32>, vector<2x32xf32>, vector<2x32xf32>, vector<2x32xf32> -> vector<2x128xf32>
    %c0_64 = arith.constant 0 : index
    %c0_65 = arith.constant 0 : index
    %165 = vector.load %arg4[%c0_64, %c0_65] : memref<208x256xf32, #tpu.memory_space<vmem>>, vector<128x256xf32>
    %c128 = arith.constant 128 : index
    %c0_66 = arith.constant 0 : index
    %166 = vector.load %arg4[%c128, %c0_66] : memref<208x256xf32, #tpu.memory_space<vmem>>, vector<1x256xf32>
    %c129 = arith.constant 129 : index
    %c0_67 = arith.constant 0 : index
    %167 = vector.load %arg4[%c129, %c0_67] : memref<208x256xf32, #tpu.memory_space<vmem>>, vector<1x256xf32>
    %cst_68 = arith.constant dense<0.000000e+00> : vector<2x256xf32>
    %168 = tpu.matmul %164, %165, %cst_68 {dimension_numbers = #tpu.dot_dimension_numbers<[1], [0], [0], [1], [0, 0, 1, 1], [], []>} : vector<2x128xf32>, vector<128x256xf32>, vector<2x256xf32> -> vector<2x256xf32>
    %169 = vector.broadcast %166 : vector<1x256xf32> to vector<2x256xf32>
    %170 = arith.addf %168, %169 : vector<2x256xf32>
    %cst_69 = arith.constant 0.000000e+00 : f32
    %171 = vector.broadcast %cst_69 : f32 to vector<2x256xf32>
    %172 = arith.maximumf %170, %171 : vector<2x256xf32>
    %173 = vector.broadcast %167 : vector<1x256xf32> to vector<2x256xf32>
    %174 = arith.mulf %172, %173 : vector<2x256xf32>
    %cst_70 = arith.constant dense<0.000000e+00> : vector<2xf32>
    %175 = vector.multi_reduction <add>, %174, %cst_70 [1] : vector<2x256xf32> to vector<2xf32>
    %176 = vector.shape_cast %175 : vector<2xf32> to vector<2x1xf32>
    %177 = arith.negf %176 : vector<2x1xf32>
    %178 = math.exp %177 : vector<2x1xf32>
    %cst_71 = arith.constant 1.000000e+00 : f32
    %179 = vector.broadcast %cst_71 : f32 to vector<2x1xf32>
    %180 = arith.addf %179, %178 : vector<2x1xf32>
    %181 = arith.divf %179, %180 : vector<2x1xf32>
    %c0_72 = arith.constant 0 : index
    %c0_73 = arith.constant 0 : index
    %182 = vector.load %arg5[%c0_72, %c0_73] : memref<2x1xf32, #tpu.memory_space<vmem>>, vector<2x1xf32>
    tpu.vector_store %arg5[%c0_72, %c0_73], %181 {strides = array<i32>} : memref<2x1xf32, #tpu.memory_space<vmem>>, vector<2x1xf32>,
    return
  }
}

</mosaic_0001>

<bundles_post_ra>
// kernel: transition_predictor_is_forward.1
= control target key start
LH: loop header
LB: loop body
LE: loop exit
PB: predicated region body
PF: predicated region fallthrough
CT: control target
= control target key end

     0   :  { %10 = vsyncpa [#allocation3], 0  ;;  %s2447_s0 = inlined_call_operand.vmem [shape: f32[2,1], index: 0, kind: input, shape index: {}]   ;;  %s2448_s1 = inlined_call_operand.hbm [shape: f32[2,8,32], index: 1, kind: input, shape index: {}]   ;;  %s2449_s2 = inlined_call_operand.vmem [shape: f32[2,1,32], index: 2, kind: input, shape index: {}]   ;;  %s2450_s3 = inlined_call_operand.hbm [shape: f32[128,128], index: 3, kind: input, shape index: {}]   ;;  %s2451_s4 = inlined_call_operand.hbm [shape: f32[208,256], index: 4, kind: input, shape index: {}]   ;;  %s2452_s5 = inlined_call_operand.vmem [shape: f32[2,1], index: 5, kind: output, shape index: {}]  }
   0x1   :  { %11 = vsyncpa [#allocation5], 0  ;;  %s1931_s18 = smov [#allocation4]   ;;  %s1932_s20 = smov [#allocation2]  }
   0x2   :  { %s33_s19 = sshll.u32 %s1931_s18, 4  ;;  %s19_s21 = sshll.u32 %s1932_s20, 4  ;;  %s34_s19 = int_to_ptr.vmem [resolvable:$true] %s33_s19  ;;  %s20_s21 = int_to_ptr.vmem [resolvable:$true] %s19_s21 }
   0x3   :  { %s1875_s22 = scalar_lea.vmem %s34_s19, 2048  ;;  %p1880_p1 = scmp.lt.s32.totalorder %s34_s19, %s34_s19 }
   0x4   :  { %p1876_p0 = scmp.ne.s32.totalorder %s34_s19, %s1875_s22  ;;  %p1881_p2 = scmp.lt.s32.totalorder %s1875_s22, %s1875_s22 }
   0x6   :  { %p1882_p3 = por %p1881_p2, %p1880_p1 }
   0x8   :  { %p1883_p4 = pnand %p1882_p3, %p1876_p0 }
   0xa   :  { %1886 = shalt.err (!%p1883_p4)
}
   0xb   :  { %s1933_s23 = smov 128   ;;  %s1934_s24 = smov 8  }
   0xc   :  { %39 = dma.hbm_to_vmem [thread:$0]  %s2450_s3, 2048, %s34_s19, [#allocation5], %s1933_s23, %s1933_s23, %s1934_s24  }
   0xd   :  { %s1895_s27 = scalar_lea.vmem %s20_s21, 256  ;;  %p1900_p6 = scmp.lt.s32.totalorder %s20_s21, %s20_s21 }
   0xe   :  { %p1896_p5 = scmp.ne.s32.totalorder %s20_s21, %s1895_s27  ;;  %p1901_p7 = scmp.lt.s32.totalorder %s1895_s27, %s1895_s27 }
  0x10   :  { %p1902_p8 = por %p1901_p7, %p1900_p6 }
  0x12   :  { %p1903_p9 = pnand %p1902_p8, %p1896_p5 }
  0x14   :  { %1906 = shalt.err (!%p1903_p9)
}
  0x15   :  { %25 = dma.hbm_to_vmem [thread:$0]  %s2448_s1, 256, %s20_s21, [#allocation3], %s1933_s23, %s1933_s23, %s1934_s24  }
  0x16   :  { %s1935_s30 = smov [#allocation6]  }
  0x17   :  { %s45_s6 = sshll.u32 %s1935_s30, 4  ;;  %s46_s6 = int_to_ptr.vmem [resolvable:$true] %s45_s6 }
  0x18   :  { %s1915_s7 = scalar_lea.vmem %s46_s6, 6656  ;;  %p1920_p11 = scmp.lt.s32.totalorder %s46_s6, %s46_s6 }
  0x19   :  { %p1916_p10 = scmp.ne.s32.totalorder %s46_s6, %s1915_s7  ;;  %p1921_p12 = scmp.lt.s32.totalorder %s1915_s7, %s1915_s7 }
  0x1b   :  { %p1922_p13 = por %p1921_p12, %p1920_p11 }
  0x1d   :  { %p1923_p0 = pnand %p1922_p13, %p1916_p10 }
  0x1f   :  { %1926 = shalt.err (!%p1923_p0)
}
  0x20   :  { %s1936_s3 = smov 256   ;;  %s1937_s8 = smov 16  }
  0x21   :  { %51 = dma.hbm_to_vmem [thread:$0]  %s2451_s4, 6656, %s46_s6, [#allocation5], %s1936_s3, %s1936_s3, %s1937_s8  }
  0x22   :  { %1927 = dma.done.wait [#allocation3], 256  }
  0x23   :  { %1928 = vsyncadd [#allocation3], 4294967040 }
  0x24   :  { %1929 = dma.done.wait [#allocation5], 8704  }
  0x25   :  { %1930 = vsyncadd [#allocation5], 4294958592  ;;  %v1938_v0 = vmov 0.0   ;;  %vm1939_vm0 = vmmov 0   ;;  %vm75_vm1 = vcmask 261120   ;;  %v64_v1 = vld [vmem:[#allocation6 + $0x180] sm:$0xff]  ;;  %v70_v23 = vlaneseq }
  0x26   :  { %1542 = vmatprep.subr.mxu0 %v1938_v0  ;;  %1574 = vmatprep.mubr.msk.f32.mxu0 %vm1939_vm0, %v1938_v0  ;;  %v63_v2 = vld [vmem:[#allocation6 + $0x170] sm:$0xff]  ;;  %v62_v4 = vld [vmem:[#allocation6 + $0x160] sm:$0xff]  ;;  %v1989_v5 = vld [vmem:[#allocation4 + $0x78] sm:$0xff]  ;;  %v1940_v39 = vmov 0.5   ;;  %vm265_vm5 = vcmask 1041409   ;;  %s1941_s1 = smov 32  }
  0x27   :  { %1496 = vmatprep.subr.mxu1 %v64_v1  ;;  %v67_v3 = vld [vmem:[#allocation2] sm:$0xff]  ;;  %1543 = vmatpush3.msra.mxu0 %v1989_v5  ;;  %v68_v8 = vld [vmem:[#allocation2 + $0x8] sm:$0xff]  ;;  %v1996_v9 = vld [vmem:[#allocation4 + $0x68] sm:$0xff]  ;;  %v2124_v24 = vshrl.u32 %v70_v23, 7  ;;  %v158_v37 = vand.u32 127, %v70_v23  ;;  %s1942_s4 = smov 64  }
  0x28   :  { %1497 = vmatpush3.msra.mxu1 %v64_v1  ;;  %1504 = vmatprep.mubr.msk.f32.mxu1 %vm75_vm1, %v67_v3  ;;  %v61_v6 = vld [vmem:[#allocation6 + $0x150] sm:$0xff]  ;;  %v2004_v10 = vld [vmem:[#allocation4 + $0x60] sm:$0xff]  ;;  %v2011_v11 = vld [vmem:[#allocation4 + $0x58] sm:$0xff]  ;;  %s1943_s11 = smov 96   ;;  %vm1188_vm6 = vcmask 523264   ;;  %vm1190_vm7 = vcmask 785408  }
  0x29   :  { %1498 = vmatprep.subr.mxu1 %v63_v2  ;;  %v1992_v7 = vld [vmem:[#allocation4 + $0x70] sm:$0xff]  ;;  %1544 = vmatprep.subr.mxu0 %v1938_v0  ;;  %v2023_v13 = vld [vmem:[#allocation4 + $0x48] sm:$0xff]  ;;  %v2029_v14 = vld [vmem:[#allocation4 + $0x40] sm:$0xff]  ;;  %v2127_v25 = vsub.s32 0, %v2124_v24  ;;  %vm159_vm2 = vcmp.ge.s32.totalorder %v158_v37, 64  ;;  %vm160_vm3 = vcmp.lt.s32.totalorder %v158_v37, 96 }
  0x2a   :  { %1499 = vmatpush3.msra.mxu1 %v63_v2  ;;  %1545 = vmatpush3.msra.mxu0 %v1992_v7  ;;  %v2017_v12 = vld [vmem:[#allocation4 + $0x50] sm:$0xff]  ;;  %v2035_v15 = vld [vmem:[#allocation4 + $0x38] sm:$0xff]  ;;  %v2047_v17 = vld [vmem:[#allocation4 + $0x28] sm:$0xff]  ;;  %vm1325_vm8 = vcmask 1041408   ;;  %vm1337_vm9 = vcmask 1024  }
  0x2b   :  { %1500 = vmatprep.subr.mxu1 %v62_v4  ;;  %1546 = vmatprep.subr.mxu0 %v1938_v0  ;;  %v2041_v16 = vld [vmem:[#allocation4 + $0x30] sm:$0xff]  ;;  %v2053_v18 = vld [vmem:[#allocation4 + $0x20] sm:$0xff]  ;;  %v2059_v19 = vld [vmem:[#allocation4 + $0x18] sm:$0xff] }
  0x2c   :  { %1501 = vmatpush3.msra.mxu1 %v62_v4  ;;  %1547 = vmatpush3.msra.mxu0 %v1996_v9  ;;  %v2065_v20 = vld [vmem:[#allocation4 + $0x10] sm:$0xff]  ;;  %v2071_v21 = vld [vmem:[#allocation4 + $0x8] sm:$0xff]  ;;  %v2077_v22 = vld [vmem:[#allocation4] sm:$0xff] }
  0x2d   :  { %1502 = vmatprep.subr.mxu1 %v61_v6  ;;  %1548 = vmatprep.subr.mxu0 %v1938_v0  ;;  %v66_v26 = vld [vmem:[#allocation6 + $0x190] ss:$8 sm:$0x3]  ;;  %vm161_vm4 = vmand %vm159_vm2, %vm160_vm3 }
  0x2e   :  { %1503 = vmatpush3.msra.mxu1 %v61_v6  ;;  %1549 = vmatpush3.msra.mxu0 %v2004_v10  ;;  %v73_v28 = vrot.slane %v66_v26, %v2127_v25  ;;  %v2136_v40 = vsel %vm161_vm4, 1.0, %v1940_v39  ;;  %v2140_v44 = vsel %vm161_vm4, 0.0, %v1940_v39 }
  0x2f   :  { %1505 = vmatmul.mubr.msk.f32.vlgmr.msra.gmra.mxu1 %vm75_vm1, %v68_v8  ;;  %1507 = vmatprep.subr.mxu1 %v1938_v0 }
  0x30   :  { %1508 = vmatpush3.msra.mxu1 %v1989_v5  ;;  %1539 = vmatprep.mubr.msk.f32.mxu1 %vm1939_vm0, %v1938_v0 }
  0x31   :  { %1509 = vmatprep.subr.mxu1 %v1938_v0  ;;  %1550 = vmatprep.subr.mxu0 %v1938_v0 }
  0x32   :  { %1510 = vmatpush3.msra.mxu1 %v1992_v7  ;;  %1551 = vmatpush3.msra.mxu0 %v2011_v11 }
  0x33   :  { %1511 = vmatprep.subr.mxu1 %v1938_v0  ;;  %1552 = vmatprep.subr.mxu0 %v1938_v0 }
  0x34   :  { %1512 = vmatpush3.msra.mxu1 %v1996_v9  ;;  %1553 = vmatpush3.msra.mxu0 %v2017_v12 }
  0x35   :  { %1513 = vmatprep.subr.mxu1 %v1938_v0  ;;  %1554 = vmatprep.subr.mxu0 %v1938_v0 }
  0x36   :  { %1514 = vmatpush3.msra.mxu1 %v2004_v10  ;;  %1555 = vmatpush3.msra.mxu0 %v2023_v13 }
  0x37   :  { %1515 = vmatprep.subr.mxu1 %v1938_v0  ;;  %1556 = vmatprep.subr.mxu0 %v1938_v0 }
  0x38   :  { %1516 = vmatpush3.msra.mxu1 %v2011_v11  ;;  %1557 = vmatpush3.msra.mxu0 %v2029_v14 }
  0x39   :  { %1517 = vmatprep.subr.mxu1 %v1938_v0  ;;  %1558 = vmatprep.subr.mxu0 %v1938_v0 }
  0x3a   :  { %1518 = vmatpush3.msra.mxu1 %v2017_v12  ;;  %1559 = vmatpush3.msra.mxu0 %v2035_v15 }
  0x3b   :  { %1519 = vmatprep.subr.mxu1 %v1938_v0  ;;  %1560 = vmatprep.subr.mxu0 %v1938_v0 }
  0x3c   :  { %1520 = vmatpush3.msra.mxu1 %v2023_v13  ;;  %1561 = vmatpush3.msra.mxu0 %v2041_v16 }
  0x3d   :  { %1521 = vmatprep.subr.mxu1 %v1938_v0  ;;  %1562 = vmatprep.subr.mxu0 %v1938_v0 }
  0x3e   :  { %1522 = vmatpush3.msra.mxu1 %v2029_v14  ;;  %1563 = vmatpush3.msra.mxu0 %v2047_v17 }
  0x3f   :  { %1523 = vmatprep.subr.mxu1 %v1938_v0  ;;  %1564 = vmatprep.subr.mxu0 %v1938_v0 }
  0x40   :  { %1524 = vmatpush3.msra.mxu1 %v2035_v15  ;;  %1565 = vmatpush3.msra.mxu0 %v2053_v18 }
  0x41   :  { %1525 = vmatprep.subr.mxu1 %v1938_v0  ;;  %1566 = vmatprep.subr.mxu0 %v1938_v0 }
  0x42   :  { %1526 = vmatpush3.msra.mxu1 %v2041_v16  ;;  %1567 = vmatpush3.msra.mxu0 %v2059_v19 }
  0x43   :  { %1527 = vmatprep.subr.mxu1 %v1938_v0  ;;  %1568 = vmatprep.subr.mxu0 %v1938_v0 }
  0x44   :  { %1528 = vmatpush3.msra.mxu1 %v2047_v17  ;;  %1569 = vmatpush3.msra.mxu0 %v2065_v20 }
  0x45   :  { %1529 = vmatprep.subr.mxu1 %v1938_v0  ;;  %1570 = vmatprep.subr.mxu0 %v1938_v0 }
  0x46   :  { %1530 = vmatpush3.msra.mxu1 %v2053_v18  ;;  %1571 = vmatpush3.msra.mxu0 %v2071_v21 }
  0x47   :  { %1531 = vmatprep.subr.mxu1 %v1938_v0  ;;  %1572 = vmatprep.subr.mxu0 %v1938_v0 }
  0x48   :  { %1532 = vmatpush3.msra.mxu1 %v2059_v19  ;;  %1573 = vmatpush3.msra.mxu0 %v2077_v22 }
  0x49   :  { %1533 = vmatprep.subr.mxu1 %v1938_v0  ;;  %1612 = vmatprep.subr.mxu0 %v1938_v0 }
  0x4a   :  { %1534 = vmatpush3.msra.mxu1 %v2065_v20 }
  0x4b   :  { %1535 = vmatprep.subr.mxu1 %v1938_v0 }
  0x4c   :  { %1536 = vmatpush3.msra.mxu1 %v2071_v21 }
  0x4d   :  { %1537 = vmatprep.subr.mxu1 %v1938_v0 }
  0x4e   :  { %1538 = vmatpush3.msra.mxu1 %v2077_v22 }
  0x4f   :  { %1540 = vmatmul.mubr.f32.vlgmr.msra.gmra.mxu1 %v1938_v0  ;;  %1577 = vmatprep.subr.mxu1 %v1938_v0 }
  0x50   :  { %1578 = vmatpush3.msra.mxu1 %v1989_v5  ;;  %1609 = vmatprep.mubr.msk.f32.mxu1 %vm1939_vm0, %v1938_v0 }
  0x51   :  { %1579 = vmatprep.subr.mxu1 %v1938_v0 }
  0x52   :  { %1580 = vmatpush3.msra.mxu1 %v1992_v7 }
  0x53   :  { %1581 = vmatprep.subr.mxu1 %v1938_v0 }
  0x54   :  { %1582 = vmatpush3.msra.mxu1 %v1996_v9 }
  0x55   :  { %1583 = vmatprep.subr.mxu1 %v1938_v0 }
  0x56   :  { %1584 = vmatpush3.msra.mxu1 %v2004_v10 }
  0x57   :  { %1585 = vmatprep.subr.mxu1 %v1938_v0 }
  0x58   :  { %1586 = vmatpush3.msra.mxu1 %v2011_v11 }
  0x59   :  { %1587 = vmatprep.subr.mxu1 %v1938_v0 }
  0x5a   :  { %1588 = vmatpush3.msra.mxu1 %v2017_v12 }
  0x5b   :  { %1589 = vmatprep.subr.mxu1 %v1938_v0 }
  0x5c   :  { %1590 = vmatpush3.msra.mxu1 %v2023_v13 }
  0x5d   :  { %1591 = vmatprep.subr.mxu1 %v1938_v0 }
  0x5e   :  { %1592 = vmatpush3.msra.mxu1 %v2029_v14 }
  0x5f   :  { %1593 = vmatprep.subr.mxu1 %v1938_v0 }
  0x60   :  { %1594 = vmatpush3.msra.mxu1 %v2035_v15 }
  0x61   :  { %1595 = vmatprep.subr.mxu1 %v1938_v0 }
  0x62   :  { %1596 = vmatpush3.msra.mxu1 %v2041_v16 }
  0x63   :  { %1597 = vmatprep.subr.mxu1 %v1938_v0 }
  0x64   :  { %1598 = vmatpush3.msra.mxu1 %v2047_v17 }
  0x65   :  { %1599 = vmatprep.subr.mxu1 %v1938_v0 }
  0x66   :  { %1600 = vmatpush3.msra.mxu1 %v2053_v18 }
  0x67   :  { %1601 = vmatprep.subr.mxu1 %v1938_v0 }
  0x68   :  { %1602 = vmatpush3.msra.mxu1 %v2059_v19 }
  0x69   :  { %1603 = vmatprep.subr.mxu1 %v1938_v0 }
  0x6a   :  { %1604 = vmatpush3.msra.mxu1 %v2065_v20 }
  0x6b   :  { %1605 = vmatprep.subr.mxu1 %v1938_v0 }
  0x6c   :  { %1606 = vmatpush3.msra.mxu1 %v2071_v21 }
  0x6d   :  { %1607 = vmatprep.subr.mxu1 %v1938_v0 }
  0x6e   :  { %1608 = vmatpush3.msra.mxu1 %v2077_v22 }
  0x6f   :  { %1647 = vmatprep.subr.mxu1 %v1938_v0 }
  0xef   :  { %v1506_v27 = vpop.f32.mrf.mxu1 }
  0xf0   :  { %v2132_v32 = vadd.f32 %v1506_v27, %v73_v28 }
  0xf1   :  { %v148_v29 = vpop.f32.mrf.mxu1 }
  0xf2   :  { %v2130_v30 = vadd.f32 %v148_v29, %v73_v28 }
 0x10f   :  { %v246_v31 = vpop.f32.mrf.mxu1 }
 0x110   :  { %v251_v33 = vrot.slane %v246_v31, 1  ;;  %v254_v34 = vadd.f32 %v246_v31, %v2130_v30 }
 0x111   :  { %v1541_v35 = vpop.f32.mrf.mxu1 }
 0x112   :  { %v255_v36 = vadd.f32 %v251_v33, %v2132_v32  ;;  %1815 = vtanh.f32 %v254_v34 }
 0x114   :  { %1817 = vtanh.f32 %v255_v36 }
 0x11f   :  { %v1816_v38 = vpop.eup %1815 }
 0x120   :  { %v258_v42 = vmul.f32 %v1816_v38, %v2136_v40 }
 0x121   :  { %v1818_v41 = vpop.eup %1817 }
 0x122   :  { %v259_v43 = vmul.f32 %v1818_v41, %v2136_v40  ;;  %v260_v46 = vadd.f32 %v258_v42, %v2140_v44 }
 0x124   :  { %v261_v45 = vadd.f32 %v259_v43, %v2140_v44 }
 0x126   :  { %v264_v47 = vrot.slane %v261_v45, 7 }
 0x128   :  { %v266_v48 = vsel %vm265_vm5, %v264_v47, %v260_v46 }
 0x129   :  { %272 = vrot.lane.b32.xlu1 %v266_v48, %s1941_s1  ;;  %270 = vrot.lane.b32.xlu0 %v266_v48, %s1942_s4 }
 0x12d   :  { %268 = vrot.lane.b32.xlu0 %v266_v48, %s1943_s11 }
 0x19b   :  { %v271_v49 = vpop.permute.xlu0 %270  ;;  %v273_v59 = vpop.permute.xlu1 %272 }
 0x19c   :  { %v276_v50 = vrot.slane %v271_v49, 1  ;;  %v279_v53 = vmul.f32 %v271_v49, %v260_v46 }
 0x19e   :  { %v280_v51 = vmul.f32 %v276_v50, %v261_v45 }
 0x19f   :  { %v269_v52 = vpop.permute.xlu0 %268 }
 0x1a0   :  { %v283_v54 = vrot.slane %v280_v51, 7  ;;  %v274_v55 = vmul.f32 0.0, %v269_v52 }
 0x1a2   :  { %v284_v56 = vsel %vm265_vm5, %v283_v54, %v279_v53 }
 0x1a3   :  { %v2149_v57 = vadd.f32 %v284_v56, %v274_v55 }
 0x1a5   :  { %1819 = vtanh.f32 %v2149_v57 }
 0x1b2   :  { %v1820_v58 = vpop.eup %1819 }
 0x1b3   :  { %v288_v60 = vmul.f32 %v1820_v58, %v273_v59 }
 0x1b5   :  { %1575 = vmatmul.mubr.f32.vlgmr.msra.gmra.mxu0 %v288_v60 }
 0x1b6   :  { %1613 = vmatpush3.msra.mxu0 %v1989_v5  ;;  %1644 = vmatprep.mubr.msk.f32.mxu0 %vm1939_vm0, %v1938_v0 }
 0x1b7   :  { %1614 = vmatprep.subr.mxu0 %v1938_v0 }
 0x1b8   :  { %1615 = vmatpush3.msra.mxu0 %v1992_v7 }
 0x1b9   :  { %1616 = vmatprep.subr.mxu0 %v1938_v0 }
 0x1ba   :  { %1617 = vmatpush3.msra.mxu0 %v1996_v9 }
 0x1bb   :  { %1618 = vmatprep.subr.mxu0 %v1938_v0 }
 0x1bc   :  { %1619 = vmatpush3.msra.mxu0 %v2004_v10 }
 0x1bd   :  { %1620 = vmatprep.subr.mxu0 %v1938_v0 }
 0x1be   :  { %1621 = vmatpush3.msra.mxu0 %v2011_v11 }
 0x1bf   :  { %1622 = vmatprep.subr.mxu0 %v1938_v0 }
 0x1c0   :  { %1623 = vmatpush3.msra.mxu0 %v2017_v12 }
 0x1c1   :  { %1624 = vmatprep.subr.mxu0 %v1938_v0 }
 0x1c2   :  { %1625 = vmatpush3.msra.mxu0 %v2023_v13 }
 0x1c3   :  { %1626 = vmatprep.subr.mxu0 %v1938_v0 }
 0x1c4   :  { %1627 = vmatpush3.msra.mxu0 %v2029_v14 }
 0x1c5   :  { %1628 = vmatprep.subr.mxu0 %v1938_v0 }
 0x1c6   :  { %1629 = vmatpush3.msra.mxu0 %v2035_v15 }
 0x1c7   :  { %1630 = vmatprep.subr.mxu0 %v1938_v0 }
 0x1c8   :  { %1631 = vmatpush3.msra.mxu0 %v2041_v16 }
 0x1c9   :  { %1632 = vmatprep.subr.mxu0 %v1938_v0 }
 0x1ca   :  { %1633 = vmatpush3.msra.mxu0 %v2047_v17 }
 0x1cb   :  { %1634 = vmatprep.subr.mxu0 %v1938_v0 }
 0x1cc   :  { %1635 = vmatpush3.msra.mxu0 %v2053_v18 }
 0x1cd   :  { %1636 = vmatprep.subr.mxu0 %v1938_v0 }
 0x1ce   :  { %1637 = vmatpush3.msra.mxu0 %v2059_v19 }
 0x1cf   :  { %1638 = vmatprep.subr.mxu0 %v1938_v0 }
 0x1d0   :  { %1639 = vmatpush3.msra.mxu0 %v2065_v20 }
 0x1d1   :  { %1640 = vmatprep.subr.mxu0 %v1938_v0 }
 0x1d2   :  { %1641 = vmatpush3.msra.mxu0 %v2071_v21 }
 0x1d3   :  { %1642 = vmatprep.subr.mxu0 %v1938_v0 }
 0x1d4   :  { %1643 = vmatpush3.msra.mxu0 %v2077_v22 }
 0x1d5   :  { %1682 = vmatprep.subr.mxu0 %v1938_v0 }
 0x275   :  { %v355_v61 = vpop.f32.mrf.mxu0 }
 0x276   :  { %v360_v62 = vrot.slane %v355_v61, 7  ;;  %v364_v63 = vadd.f32 %v355_v61, %v2132_v32 }
 0x277   :  { %v1576_v1 = vpop.f32.mrf.mxu0 }
 0x278   :  { %v363_v2 = vadd.f32 %v360_v62, %v2130_v30  ;;  %1821 = vtanh.f32 %v364_v63 }
 0x27a   :  { %1823 = vtanh.f32 %v363_v2 }
 0x285   :  { %v1822_v3 = vpop.eup %1821 }
 0x286   :  { %v368_v8 = vmul.f32 %v1822_v3, %v2136_v40 }
 0x287   :  { %v1824_v4 = vpop.eup %1823 }
 0x288   :  { %v367_v6 = vmul.f32 %v1824_v4, %v2136_v40  ;;  %v370_v26 = vadd.f32 %v368_v8, %v2140_v44 }
 0x28a   :  { %v369_v23 = vadd.f32 %v367_v6, %v2140_v44 }
 0x28c   :  { %v373_v27 = vrot.slane %v369_v23, 1 }
 0x28e   :  { %v374_v28 = vsel %vm265_vm5, %v370_v26, %v373_v27 }
 0x28f   :  { %376 = vrot.lane.b32.xlu0 %v374_v28, %s1943_s11  ;;  %378 = vrot.lane.b32.xlu1 %v374_v28, %s1942_s4 }
 0x293   :  { %380 = vrot.lane.b32.xlu1 %v374_v28, %s1941_s1 }
 0x301   :  { %v379_v29 = vpop.permute.xlu1 %378  ;;  %v377_v33 = vpop.permute.xlu0 %376 }
 0x302   :  { %v384_v31 = vrot.slane %v379_v29, 7  ;;  %v388_v35 = vmul.f32 %v379_v29, %v370_v26  ;;  %v382_v37 = vmul.f32 %v377_v33, %v2149_v57 }
 0x304   :  { %v387_v34 = vmul.f32 %v384_v31, %v369_v23 }
 0x305   :  { %v381_v42 = vpop.permute.xlu1 %380 }
 0x306   :  { %v391_v36 = vrot.slane %v387_v34, 1 }
 0x308   :  { %v392_v38 = vsel %vm265_vm5, %v388_v35, %v391_v36 }
 0x309   :  { %v2198_v39 = vadd.f32 %v392_v38, %v382_v37 }
 0x30b   :  { %1825 = vtanh.f32 %v2198_v39 }
 0x318   :  { %v1826_v41 = vpop.eup %1825 }
 0x319   :  { %v396_v43 = vmul.f32 %v1826_v41, %v381_v42 }
 0x31b   :  { %1610 = vmatmul.mubr.f32.vlgmr.msra.gmra.mxu1 %v396_v43 }
 0x31c   :  { %1648 = vmatpush3.msra.mxu1 %v1989_v5  ;;  %1679 = vmatprep.mubr.msk.f32.mxu1 %vm1939_vm0, %v1938_v0 }
 0x31d   :  { %1649 = vmatprep.subr.mxu1 %v1938_v0 }
 0x31e   :  { %1650 = vmatpush3.msra.mxu1 %v1992_v7 }
 0x31f   :  { %1651 = vmatprep.subr.mxu1 %v1938_v0 }
 0x320   :  { %1652 = vmatpush3.msra.mxu1 %v1996_v9 }
 0x321   :  { %1653 = vmatprep.subr.mxu1 %v1938_v0 }
 0x322   :  { %1654 = vmatpush3.msra.mxu1 %v2004_v10 }
 0x323   :  { %1655 = vmatprep.subr.mxu1 %v1938_v0 }
 0x324   :  { %1656 = vmatpush3.msra.mxu1 %v2011_v11 }
 0x325   :  { %1657 = vmatprep.subr.mxu1 %v1938_v0 }
 0x326   :  { %1658 = vmatpush3.msra.mxu1 %v2017_v12 }
 0x327   :  { %1659 = vmatprep.subr.mxu1 %v1938_v0 }
 0x328   :  { %1660 = vmatpush3.msra.mxu1 %v2023_v13 }
 0x329   :  { %1661 = vmatprep.subr.mxu1 %v1938_v0 }
 0x32a   :  { %1662 = vmatpush3.msra.mxu1 %v2029_v14 }
 0x32b   :  { %1663 = vmatprep.subr.mxu1 %v1938_v0 }
 0x32c   :  { %1664 = vmatpush3.msra.mxu1 %v2035_v15 }
 0x32d   :  { %1665 = vmatprep.subr.mxu1 %v1938_v0 }
 0x32e   :  { %1666 = vmatpush3.msra.mxu1 %v2041_v16 }
 0x32f   :  { %1667 = vmatprep.subr.mxu1 %v1938_v0 }
 0x330   :  { %1668 = vmatpush3.msra.mxu1 %v2047_v17 }
 0x331   :  { %1669 = vmatprep.subr.mxu1 %v1938_v0 }
 0x332   :  { %1670 = vmatpush3.msra.mxu1 %v2053_v18 }
 0x333   :  { %1671 = vmatprep.subr.mxu1 %v1938_v0 }
 0x334   :  { %1672 = vmatpush3.msra.mxu1 %v2059_v19 }
 0x335   :  { %1673 = vmatprep.subr.mxu1 %v1938_v0 }
 0x336   :  { %1674 = vmatpush3.msra.mxu1 %v2065_v20 }
 0x337   :  { %1675 = vmatprep.subr.mxu1 %v1938_v0 }
 0x338   :  { %1676 = vmatpush3.msra.mxu1 %v2071_v21 }
 0x339   :  { %1677 = vmatprep.subr.mxu1 %v1938_v0 }
 0x33a   :  { %1678 = vmatpush3.msra.mxu1 %v2077_v22 }
 0x33b   :  { %1717 = vmatprep.subr.mxu1 %v1938_v0 }
 0x3db   :  { %v463_v45 = vpop.f32.mrf.mxu1 }
 0x3dc   :  { %v468_v46 = vrot.slane %v463_v45, 6  ;;  %v469_v47 = vrot.slane %v463_v45, 7 }
 0x3dd   :  { %v1611_v48 = vpop.f32.mrf.mxu1 }
 0x3de   :  { %v472_v49 = vadd.f32 %v468_v46, %v2130_v30  ;;  %v473_v50 = vadd.f32 %v469_v47, %v2132_v32 }
 0x3e0   :  { %1827 = vtanh.f32 %v472_v49 }
 0x3e1   :  { %1829 = vtanh.f32 %v473_v50 }
 0x3ed   :  { %v1828_v51 = vpop.eup %1827 }
 0x3ee   :  { %v1830_v52 = vpop.eup %1829  ;;  %v476_v53 = vmul.f32 %v1828_v51, %v2136_v40 }
 0x3ef   :  { %v477_v54 = vmul.f32 %v1830_v52, %v2136_v40 }
 0x3f0   :  { %v478_v55 = vadd.f32 %v476_v53, %v2140_v44 }
 0x3f1   :  { %v479_v56 = vadd.f32 %v477_v54, %v2140_v44 }
 0x3f2   :  { %v482_v57 = vrot.slane %v478_v55, 2 }
 0x3f3   :  { %v483_v58 = vrot.slane %v479_v56, 1 }
 0x3f5   :  { %v484_v59 = vsel %vm265_vm5, %v483_v58, %v482_v57 }
 0x3f6   :  { %486 = vrot.lane.b32.xlu1 %v484_v59, %s1943_s11  ;;  %488 = vrot.lane.b32.xlu0 %v484_v59, %s1942_s4 }
 0x3fa   :  { %490 = vrot.lane.b32.xlu0 %v484_v59, %s1941_s1 }
 0x468   :  { %v489_v60 = vpop.permute.xlu0 %488  ;;  %v487_v63 = vpop.permute.xlu1 %486 }
 0x469   :  { %v494_v61 = vrot.slane %v489_v60, 6  ;;  %v495_v62 = vrot.slane %v489_v60, 7  ;;  %v492_v6 = vmul.f32 %v487_v63, %v2198_v39 }
 0x46b   :  { %v498_v1 = vmul.f32 %v494_v61, %v478_v55  ;;  %v499_v2 = vmul.f32 %v495_v62, %v479_v56 }
 0x46c   :  { %v491_v27 = vpop.permute.xlu0 %490 }
 0x46d   :  { %v502_v3 = vrot.slane %v498_v1, 2  ;;  %v503_v4 = vrot.slane %v499_v2, 1 }
 0x46f   :  { %v504_v8 = vsel %vm265_vm5, %v503_v4, %v502_v3 }
 0x470   :  { %v2247_v23 = vadd.f32 %v504_v8, %v492_v6 }
 0x472   :  { %1831 = vtanh.f32 %v2247_v23 }
 0x47f   :  { %v1832_v26 = vpop.eup %1831 }
 0x480   :  { %v508_v28 = vmul.f32 %v1832_v26, %v491_v27 }
 0x482   :  { %1645 = vmatmul.mubr.f32.vlgmr.msra.gmra.mxu0 %v508_v28 }
 0x483   :  { %1683 = vmatpush3.msra.mxu0 %v1989_v5  ;;  %1714 = vmatprep.mubr.msk.f32.mxu0 %vm1939_vm0, %v1938_v0 }
 0x484   :  { %1684 = vmatprep.subr.mxu0 %v1938_v0 }
 0x485   :  { %1685 = vmatpush3.msra.mxu0 %v1992_v7 }
 0x486   :  { %1686 = vmatprep.subr.mxu0 %v1938_v0 }
 0x487   :  { %1687 = vmatpush3.msra.mxu0 %v1996_v9 }
 0x488   :  { %1688 = vmatprep.subr.mxu0 %v1938_v0 }
 0x489   :  { %1689 = vmatpush3.msra.mxu0 %v2004_v10 }
 0x48a   :  { %1690 = vmatprep.subr.mxu0 %v1938_v0 }
 0x48b   :  { %1691 = vmatpush3.msra.mxu0 %v2011_v11 }
 0x48c   :  { %1692 = vmatprep.subr.mxu0 %v1938_v0 }
 0x48d   :  { %1693 = vmatpush3.msra.mxu0 %v2017_v12 }
 0x48e   :  { %1694 = vmatprep.subr.mxu0 %v1938_v0 }
 0x48f   :  { %1695 = vmatpush3.msra.mxu0 %v2023_v13 }
 0x490   :  { %1696 = vmatprep.subr.mxu0 %v1938_v0 }
 0x491   :  { %1697 = vmatpush3.msra.mxu0 %v2029_v14 }
 0x492   :  { %1698 = vmatprep.subr.mxu0 %v1938_v0 }
 0x493   :  { %1699 = vmatpush3.msra.mxu0 %v2035_v15 }
 0x494   :  { %1700 = vmatprep.subr.mxu0 %v1938_v0 }
 0x495   :  { %1701 = vmatpush3.msra.mxu0 %v2041_v16 }
 0x496   :  { %1702 = vmatprep.subr.mxu0 %v1938_v0 }
 0x497   :  { %1703 = vmatpush3.msra.mxu0 %v2047_v17 }
 0x498   :  { %1704 = vmatprep.subr.mxu0 %v1938_v0 }
 0x499   :  { %1705 = vmatpush3.msra.mxu0 %v2053_v18 }
 0x49a   :  { %1706 = vmatprep.subr.mxu0 %v1938_v0 }
 0x49b   :  { %1707 = vmatpush3.msra.mxu0 %v2059_v19 }
 0x49c   :  { %1708 = vmatprep.subr.mxu0 %v1938_v0 }
 0x49d   :  { %1709 = vmatpush3.msra.mxu0 %v2065_v20 }
 0x49e   :  { %1710 = vmatprep.subr.mxu0 %v1938_v0 }
 0x49f   :  { %1711 = vmatpush3.msra.mxu0 %v2071_v21 }
 0x4a0   :  { %1712 = vmatprep.subr.mxu0 %v1938_v0 }
 0x4a1   :  { %1713 = vmatpush3.msra.mxu0 %v2077_v22 }
 0x4a2   :  { %1752 = vmatprep.subr.mxu0 %v1938_v0 }
 0x542   :  { %v575_v29 = vpop.f32.mrf.mxu0 }
 0x543   :  { %v580_v31 = vrot.slane %v575_v29, 5  ;;  %v581_v33 = vrot.slane %v575_v29, 6 }
 0x544   :  { %v1646_v34 = vpop.f32.mrf.mxu0 }
 0x545   :  { %v584_v35 = vadd.f32 %v580_v31, %v2130_v30  ;;  %v585_v36 = vadd.f32 %v581_v33, %v2132_v32 }
 0x547   :  { %1833 = vtanh.f32 %v584_v35 }
 0x548   :  { %1835 = vtanh.f32 %v585_v36 }
 0x554   :  { %v1834_v37 = vpop.eup %1833 }
 0x555   :  { %v1836_v38 = vpop.eup %1835  ;;  %v588_v39 = vmul.f32 %v1834_v37, %v2136_v40 }
 0x556   :  { %v589_v41 = vmul.f32 %v1836_v38, %v2136_v40 }
 0x557   :  { %v590_v42 = vadd.f32 %v588_v39, %v2140_v44 }
 0x558   :  { %v591_v43 = vadd.f32 %v589_v41, %v2140_v44 }
 0x559   :  { %v594_v45 = vrot.slane %v590_v42, 3 }
 0x55a   :  { %v595_v46 = vrot.slane %v591_v43, 2 }
 0x55c   :  { %v596_v47 = vsel %vm265_vm5, %v595_v46, %v594_v45 }
 0x55d   :  { %598 = vrot.lane.b32.xlu0 %v596_v47, %s1943_s11  ;;  %600 = vrot.lane.b32.xlu1 %v596_v47, %s1942_s4 }
 0x561   :  { %602 = vrot.lane.b32.xlu1 %v596_v47, %s1941_s1 }
 0x5cf   :  { %v601_v48 = vpop.permute.xlu1 %600  ;;  %v599_v51 = vpop.permute.xlu0 %598 }
 0x5d0   :  { %v606_v49 = vrot.slane %v601_v48, 5  ;;  %v607_v50 = vrot.slane %v601_v48, 6  ;;  %v604_v56 = vmul.f32 %v599_v51, %v2247_v23 }
 0x5d2   :  { %v610_v52 = vmul.f32 %v606_v49, %v590_v42  ;;  %v611_v53 = vmul.f32 %v607_v50, %v591_v43 }
 0x5d3   :  { %v603_v60 = vpop.permute.xlu1 %602 }
 0x5d4   :  { %v614_v54 = vrot.slane %v610_v52, 3  ;;  %v615_v55 = vrot.slane %v611_v53, 2 }
 0x5d6   :  { %v616_v57 = vsel %vm265_vm5, %v615_v55, %v614_v54 }
 0x5d7   :  { %v2296_v58 = vadd.f32 %v616_v57, %v604_v56 }
 0x5d9   :  { %1837 = vtanh.f32 %v2296_v58 }
 0x5e6   :  { %v1838_v59 = vpop.eup %1837 }
 0x5e7   :  { %v620_v61 = vmul.f32 %v1838_v59, %v603_v60 }
 0x5e9   :  { %1680 = vmatmul.mubr.f32.vlgmr.msra.gmra.mxu1 %v620_v61 }
 0x5ea   :  { %1718 = vmatpush3.msra.mxu1 %v1989_v5  ;;  %1749 = vmatprep.mubr.msk.f32.mxu1 %vm1939_vm0, %v1938_v0 }
 0x5eb   :  { %1719 = vmatprep.subr.mxu1 %v1938_v0 }
 0x5ec   :  { %1720 = vmatpush3.msra.mxu1 %v1992_v7 }
 0x5ed   :  { %1721 = vmatprep.subr.mxu1 %v1938_v0 }
 0x5ee   :  { %1722 = vmatpush3.msra.mxu1 %v1996_v9 }
 0x5ef   :  { %1723 = vmatprep.subr.mxu1 %v1938_v0 }
 0x5f0   :  { %1724 = vmatpush3.msra.mxu1 %v2004_v10 }
 0x5f1   :  { %1725 = vmatprep.subr.mxu1 %v1938_v0 }
 0x5f2   :  { %1726 = vmatpush3.msra.mxu1 %v2011_v11 }
 0x5f3   :  { %1727 = vmatprep.subr.mxu1 %v1938_v0 }
 0x5f4   :  { %1728 = vmatpush3.msra.mxu1 %v2017_v12 }
 0x5f5   :  { %1729 = vmatprep.subr.mxu1 %v1938_v0 }
 0x5f6   :  { %1730 = vmatpush3.msra.mxu1 %v2023_v13 }
 0x5f7   :  { %1731 = vmatprep.subr.mxu1 %v1938_v0 }
 0x5f8   :  { %1732 = vmatpush3.msra.mxu1 %v2029_v14 }
 0x5f9   :  { %1733 = vmatprep.subr.mxu1 %v1938_v0 }
 0x5fa   :  { %1734 = vmatpush3.msra.mxu1 %v2035_v15 }
 0x5fb   :  { %1735 = vmatprep.subr.mxu1 %v1938_v0 }
 0x5fc   :  { %1736 = vmatpush3.msra.mxu1 %v2041_v16 }
 0x5fd   :  { %1737 = vmatprep.subr.mxu1 %v1938_v0 }
 0x5fe   :  { %1738 = vmatpush3.msra.mxu1 %v2047_v17 }
 0x5ff   :  { %1739 = vmatprep.subr.mxu1 %v1938_v0 }
 0x600   :  { %1740 = vmatpush3.msra.mxu1 %v2053_v18 }
 0x601   :  { %1741 = vmatprep.subr.mxu1 %v1938_v0 }
 0x602   :  { %1742 = vmatpush3.msra.mxu1 %v2059_v19 }
 0x603   :  { %1743 = vmatprep.subr.mxu1 %v1938_v0 }
 0x604   :  { %1744 = vmatpush3.msra.mxu1 %v2065_v20 }
 0x605   :  { %1745 = vmatprep.subr.mxu1 %v1938_v0 }
 0x606   :  { %1746 = vmatpush3.msra.mxu1 %v2071_v21 }
 0x607   :  { %1747 = vmatprep.subr.mxu1 %v1938_v0 }
 0x608   :  { %1748 = vmatpush3.msra.mxu1 %v2077_v22 }
 0x609   :  { %1787 = vmatprep.subr.mxu1 %v1938_v0 }
 0x6a9   :  { %v687_v62 = vpop.f32.mrf.mxu1 }
 0x6aa   :  { %v692_v63 = vrot.slane %v687_v62, 4  ;;  %v693_v1 = vrot.slane %v687_v62, 5 }
 0x6ab   :  { %v1681_v2 = vpop.f32.mrf.mxu1 }
 0x6ac   :  { %v696_v3 = vadd.f32 %v692_v63, %v2130_v30  ;;  %v697_v4 = vadd.f32 %v693_v1, %v2132_v32 }
 0x6ae   :  { %1839 = vtanh.f32 %v696_v3 }
 0x6af   :  { %1841 = vtanh.f32 %v697_v4 }
 0x6bb   :  { %v1840_v6 = vpop.eup %1839 }
 0x6bc   :  { %v1842_v8 = vpop.eup %1841  ;;  %v700_v23 = vmul.f32 %v1840_v6, %v2136_v40 }
 0x6bd   :  { %v701_v26 = vmul.f32 %v1842_v8, %v2136_v40 }
 0x6be   :  { %v702_v27 = vadd.f32 %v700_v23, %v2140_v44 }
 0x6bf   :  { %v703_v28 = vadd.f32 %v701_v26, %v2140_v44 }
 0x6c0   :  { %v706_v29 = vrot.slane %v702_v27, 4 }
 0x6c1   :  { %v707_v31 = vrot.slane %v703_v28, 3 }
 0x6c3   :  { %v708_v33 = vsel %vm265_vm5, %v707_v31, %v706_v29 }
 0x6c4   :  { %710 = vrot.lane.b32.xlu1 %v708_v33, %s1943_s11  ;;  %712 = vrot.lane.b32.xlu0 %v708_v33, %s1942_s4 }
 0x6c8   :  { %714 = vrot.lane.b32.xlu0 %v708_v33, %s1941_s1 }
 0x736   :  { %v713_v34 = vpop.permute.xlu0 %712  ;;  %v711_v37 = vpop.permute.xlu1 %710 }
 0x737   :  { %v718_v35 = vrot.slane %v713_v34, 4  ;;  %v719_v36 = vrot.slane %v713_v34, 5  ;;  %v716_v43 = vmul.f32 %v711_v37, %v2296_v58 }
 0x739   :  { %v722_v38 = vmul.f32 %v718_v35, %v702_v27  ;;  %v723_v39 = vmul.f32 %v719_v36, %v703_v28 }
 0x73a   :  { %v715_v48 = vpop.permute.xlu0 %714 }
 0x73b   :  { %v726_v41 = vrot.slane %v722_v38, 4  ;;  %v727_v42 = vrot.slane %v723_v39, 3 }
 0x73d   :  { %v728_v45 = vsel %vm265_vm5, %v727_v42, %v726_v41 }
 0x73e   :  { %v2345_v46 = vadd.f32 %v728_v45, %v716_v43 }
 0x740   :  { %1843 = vtanh.f32 %v2345_v46 }
 0x74d   :  { %v1844_v47 = vpop.eup %1843 }
 0x74e   :  { %v732_v49 = vmul.f32 %v1844_v47, %v715_v48 }
 0x750   :  { %1715 = vmatmul.mubr.f32.vlgmr.msra.gmra.mxu0 %v732_v49 }
 0x751   :  { %1753 = vmatpush3.msra.mxu0 %v1989_v5  ;;  %1784 = vmatprep.mubr.msk.f32.mxu0 %vm1939_vm0, %v1938_v0 }
 0x752   :  { %1754 = vmatprep.subr.mxu0 %v1938_v0 }
 0x753   :  { %1755 = vmatpush3.msra.mxu0 %v1992_v7 }
 0x754   :  { %1756 = vmatprep.subr.mxu0 %v1938_v0 }
 0x755   :  { %1757 = vmatpush3.msra.mxu0 %v1996_v9 }
 0x756   :  { %1758 = vmatprep.subr.mxu0 %v1938_v0 }
 0x757   :  { %1759 = vmatpush3.msra.mxu0 %v2004_v10 }
 0x758   :  { %1760 = vmatprep.subr.mxu0 %v1938_v0 }
 0x759   :  { %1761 = vmatpush3.msra.mxu0 %v2011_v11 }
 0x75a   :  { %1762 = vmatprep.subr.mxu0 %v1938_v0 }
 0x75b   :  { %1763 = vmatpush3.msra.mxu0 %v2017_v12 }
 0x75c   :  { %1764 = vmatprep.subr.mxu0 %v1938_v0 }
 0x75d   :  { %1765 = vmatpush3.msra.mxu0 %v2023_v13 }
 0x75e   :  { %1766 = vmatprep.subr.mxu0 %v1938_v0 }
 0x75f   :  { %1767 = vmatpush3.msra.mxu0 %v2029_v14 }
 0x760   :  { %1768 = vmatprep.subr.mxu0 %v1938_v0 }
 0x761   :  { %1769 = vmatpush3.msra.mxu0 %v2035_v15 }
 0x762   :  { %1770 = vmatprep.subr.mxu0 %v1938_v0 }
 0x763   :  { %1771 = vmatpush3.msra.mxu0 %v2041_v16 }
 0x764   :  { %1772 = vmatprep.subr.mxu0 %v1938_v0 }
 0x765   :  { %1773 = vmatpush3.msra.mxu0 %v2047_v17 }
 0x766   :  { %1774 = vmatprep.subr.mxu0 %v1938_v0 }
 0x767   :  { %1775 = vmatpush3.msra.mxu0 %v2053_v18 }
 0x768   :  { %1776 = vmatprep.subr.mxu0 %v1938_v0 }
 0x769   :  { %1777 = vmatpush3.msra.mxu0 %v2059_v19 }
 0x76a   :  { %1778 = vmatprep.subr.mxu0 %v1938_v0 }
 0x76b   :  { %1779 = vmatpush3.msra.mxu0 %v2065_v20 }
 0x76c   :  { %1780 = vmatprep.subr.mxu0 %v1938_v0 }
 0x76d   :  { %1781 = vmatpush3.msra.mxu0 %v2071_v21 }
 0x76e   :  { %1782 = vmatprep.subr.mxu0 %v1938_v0 }
 0x76f   :  { %1783 = vmatpush3.msra.mxu0 %v2077_v22 }
 0x810   :  { %v799_v5 = vpop.f32.mrf.mxu0 }
 0x811   :  { %v804_v7 = vrot.slane %v799_v5, 3  ;;  %v805_v9 = vrot.slane %v799_v5, 4 }
 0x812   :  { %v1716_v10 = vpop.f32.mrf.mxu0 }
 0x813   :  { %v808_v11 = vadd.f32 %v804_v7, %v2130_v30  ;;  %v809_v12 = vadd.f32 %v805_v9, %v2132_v32  ;;  %v1944_v7 = vmov 0  }
 0x814   :  { %1813 = vset.pattern.permute.xlu1 %v1944_v7  ;;  %1814 = vset.pattern.permute.xlu0 %v1944_v7  ;;  %v1207_v7 = vld [vmem:[#allocation6 + $0x78] sm:$0xff] }
 0x815   :  { %1845 = vtanh.f32 %v808_v11 }
 0x816   :  { %1847 = vtanh.f32 %v809_v12 }
 0x822   :  { %v1846_v13 = vpop.eup %1845 }
 0x823   :  { %v1848_v14 = vpop.eup %1847  ;;  %v812_v15 = vmul.f32 %v1846_v13, %v2136_v40 }
 0x824   :  { %v813_v16 = vmul.f32 %v1848_v14, %v2136_v40 }
 0x825   :  { %v814_v17 = vadd.f32 %v812_v15, %v2140_v44 }
 0x826   :  { %v815_v18 = vadd.f32 %v813_v16, %v2140_v44 }
 0x827   :  { %v818_v19 = vrot.slane %v814_v17, 5 }
 0x828   :  { %v819_v20 = vrot.slane %v815_v18, 4 }
 0x82a   :  { %v820_v21 = vsel %vm265_vm5, %v819_v20, %v818_v19 }
 0x82b   :  { %822 = vrot.lane.b32.xlu0 %v820_v21, %s1943_s11  ;;  %824 = vrot.lane.b32.xlu1 %v820_v21, %s1942_s4 }
 0x82f   :  { %826 = vrot.lane.b32.xlu1 %v820_v21, %s1941_s1 }
 0x89d   :  { %v825_v22 = vpop.permute.xlu1 %824  ;;  %v823_v52 = vpop.permute.xlu0 %822 }
 0x89e   :  { %v830_v50 = vrot.slane %v825_v22, 3  ;;  %v831_v51 = vrot.slane %v825_v22, 4  ;;  %v828_v57 = vmul.f32 %v823_v52, %v2345_v46  ;;  %v1153_v52 = vld [vmem:[%s2449_s2] sm:$0x1] }
 0x8a0   :  { %v834_v53 = vmul.f32 %v830_v50, %v814_v17  ;;  %v835_v54 = vmul.f32 %v831_v51, %v815_v18  ;;  %v1076_v51 = vld [vmem:[#allocation6 + $0x110] sm:$0xff] }
 0x8a1   :  { %v827_v61 = vpop.permute.xlu1 %826 }
 0x8a2   :  { %v838_v55 = vrot.slane %v834_v53, 5  ;;  %v839_v56 = vrot.slane %v835_v54, 4  ;;  %v1154_v53 = vld [vmem:[%s2449_s2 + $0x1] sm:$0x1]  ;;  %v1945_v54 = vmov 1966171168  }
 0x8a4   :  { %v840_v58 = vsel %vm265_vm5, %v839_v56, %v838_v55  ;;  %v1159_v55 = vunpack.c.l.s4 %v1945_v54  ;;  %v1157_v56 = vcombine.low %v1153_v52, %v1154_v53 }
 0x8a5   :  { %v842_v59 = vadd.f32 %v840_v58, %v828_v57 }
 0x8a6   :  { %v1160_v57 = vunpack.c.0.s8 %v1159_v55 }
 0x8a7   :  { %1849 = vtanh.f32 %v842_v59 }
 0x8a8   :  { %v1163_v58 = vsub.s32 %v1160_v57, %v2124_v24 }
 0x8b4   :  { %v1850_v60 = vpop.eup %1849 }
 0x8b5   :  { %v844_v62 = vmul.f32 %v1850_v60, %v827_v61 }
 0x8b7   :  { %1750 = vmatmul.mubr.f32.vlgmr.msra.gmra.mxu1 %v844_v62 }
 0x8b8   :  { %1795 = vmatprep.mubr.msk.f32.mxu1 %vm1939_vm0, %v1938_v0 }
 0x977   :  { %v911_v63 = vpop.f32.mrf.mxu1 }
 0x978   :  { %v916_v1 = vrot.slane %v911_v63, 2  ;;  %v917_v2 = vrot.slane %v911_v63, 3 }
 0x979   :  { %v1751_v3 = vpop.f32.mrf.mxu1 }
 0x97a   :  { %v920_v4 = vadd.f32 %v916_v1, %v2130_v30  ;;  %v921_v6 = vadd.f32 %v917_v2, %v2132_v32 }
 0x97c   :  { %1851 = vtanh.f32 %v920_v4 }
 0x97d   :  { %1853 = vtanh.f32 %v921_v6 }
 0x989   :  { %v1852_v8 = vpop.eup %1851 }
 0x98a   :  { %v1854_v23 = vpop.eup %1853  ;;  %v924_v26 = vmul.f32 %v1852_v8, %v2136_v40 }
 0x98b   :  { %v925_v27 = vmul.f32 %v1854_v23, %v2136_v40 }
 0x98c   :  { %v926_v28 = vadd.f32 %v924_v26, %v2140_v44 }
 0x98d   :  { %v927_v29 = vadd.f32 %v925_v27, %v2140_v44 }
 0x98e   :  { %v930_v31 = vrot.slane %v926_v28, 6 }
 0x98f   :  { %v931_v33 = vrot.slane %v927_v29, 5 }
 0x991   :  { %v932_v34 = vsel %vm265_vm5, %v931_v33, %v930_v31  ;;  %v1223_v33 = vld [vmem:[#allocation6 + $0xf8] sm:$0xff] }
 0x992   :  { %934 = vrot.lane.b32.xlu1 %v932_v34, %s1943_s11  ;;  %936 = vrot.lane.b32.xlu0 %v932_v34, %s1942_s4 }
 0x993   :  { %1239 = vmatprep.subr.mxu0 %v1223_v33 }
 0x996   :  { %938 = vrot.lane.b32.xlu0 %v932_v34, %s1941_s1  ;;  %v1222_v34 = vld [vmem:[#allocation6 + $0xf0] sm:$0xff] }
 0xa04   :  { %v937_v35 = vpop.permute.xlu0 %936  ;;  %v935_v38 = vpop.permute.xlu1 %934 }
 0xa05   :  { %v942_v36 = vrot.slane %v937_v35, 2  ;;  %v943_v37 = vrot.slane %v937_v35, 3  ;;  %v940_v45 = vmul.f32 %v935_v38, %v842_v59  ;;  %v1164_v59 = vrot.slane %v1157_v56, %v1163_v58  ;;  %v1221_v35 = vld [vmem:[#allocation6 + $0xe8] sm:$0xff]  ;;  %v1218_v38 = vld [vmem:[#allocation6 + $0xd0] sm:$0xff] }
 0xa07   :  { %v946_v39 = vmul.f32 %v942_v36, %v926_v28  ;;  %v947_v41 = vmul.f32 %v943_v37, %v927_v29  ;;  %v2430_v60 = vrot.slane %v1164_v59, %v1163_v58  ;;  %v1220_v36 = vld [vmem:[#allocation6 + $0xe0] sm:$0xff]  ;;  %v1219_v37 = vld [vmem:[#allocation6 + $0xd8] sm:$0xff]  ;;  %v1235_v59 = vsub.s32 1, %v2124_v24 }
 0xa08   :  { %v939_v49 = vpop.permute.xlu0 %938  ;;  %v1225_v58 = vld [vmem:[#allocation6 + $0x100] ss:$8 sm:$0x3] }
 0xa09   :  { %v950_v42 = vrot.slane %v946_v39, 6  ;;  %v951_v43 = vrot.slane %v947_v41, 5  ;;  %v1217_v39 = vld [vmem:[#allocation6 + $0xc8] sm:$0xff]  ;;  %v1216_v41 = vld [vmem:[#allocation6 + $0xc0] sm:$0xff] }
 0xa0b   :  { %v952_v46 = vsel %vm265_vm5, %v951_v43, %v950_v42  ;;  %v1215_v42 = vld [vmem:[#allocation6 + $0xb8] sm:$0xff]  ;;  %v1214_v43 = vld [vmem:[#allocation6 + $0xb0] sm:$0xff] }
 0xa0c   :  { %v954_v47 = vadd.f32 %v952_v46, %v940_v45  ;;  %v1213_v45 = vld [vmem:[#allocation6 + $0xa8] sm:$0xff]  ;;  %v1212_v46 = vld [vmem:[#allocation6 + $0xa0] sm:$0xff] }
 0xa0e   :  { %1855 = vtanh.f32 %v954_v47 }
 0xa1b   :  { %v1856_v48 = vpop.eup %1855 }
 0xa1c   :  { %v956_v5 = vmul.f32 %v1856_v48, %v939_v49  ;;  %v1210_v48 = vld [vmem:[#allocation6 + $0x90] sm:$0xff]  ;;  %v1209_v49 = vld [vmem:[#allocation6 + $0x88] sm:$0xff] }
 0xa1e   :  { %1785 = vmatmul.mubr.f32.vlgmr.msra.gmra.mxu0 %v956_v5  ;;  %v1208_v5 = vld [vmem:[#allocation6 + $0x80] sm:$0xff] }
 0xa1f   :  { %1303 = vmatprep.mubr.f32.mxu0 %v1938_v0  ;;  %1240 = vmatpush1.msra.mxu0 %v1222_v34 }
 0xa20   :  { %1241 = vmatprep.subr.mxu0 %v1221_v35 }
 0xa21   :  { %1242 = vmatpush1.msra.mxu0 %v1220_v36 }
 0xa22   :  { %1243 = vmatprep.subr.mxu0 %v1219_v37 }
 0xa23   :  { %1244 = vmatpush1.msra.mxu0 %v1218_v38 }
 0xa24   :  { %1245 = vmatprep.subr.mxu0 %v1217_v39 }
 0xa25   :  { %1246 = vmatpush1.msra.mxu0 %v1216_v41 }
 0xa26   :  { %1247 = vmatprep.subr.mxu0 %v1215_v42 }
 0xa27   :  { %1248 = vmatpush1.msra.mxu0 %v1214_v43 }
 0xa28   :  { %1249 = vmatprep.subr.mxu0 %v1213_v45 }
 0xa29   :  { %1250 = vmatpush1.msra.mxu0 %v1212_v46 }
 0xade   :  { %v1023_v9 = vpop.f32.mrf.mxu0 }
 0xadf   :  { %v1028_v10 = vrot.slane %v1023_v9, 1  ;;  %v1029_v11 = vrot.slane %v1023_v9, 2  ;;  %v1206_v9 = vld [vmem:[#allocation6 + $0x70] sm:$0xff] }
 0xae0   :  { %v1786_v12 = vpop.f32.mrf.mxu0 }
 0xae1   :  { %v1032_v13 = vadd.f32 %v1028_v10, %v2130_v30  ;;  %v1033_v14 = vadd.f32 %v1029_v11, %v2132_v32  ;;  %v1069_v30 = vld [vmem:[%s2447_s0] sm:$0x3]  ;;  %v1079_v32 = vld [vmem:[#allocation6 + $0x140] sm:$0xff]  ;;  %v1205_v10 = vld [vmem:[#allocation6 + $0x68] sm:$0xff] }
 0xae2   :  { %1788 = vmatpush3.msra.mxu1 %v1079_v32  ;;  %v1204_v11 = vld [vmem:[#allocation6 + $0x60] sm:$0xff]  ;;  %v1203_v12 = vld [vmem:[#allocation6 + $0x58] sm:$0xff] }
 0xae3   :  { %1857 = vtanh.f32 %v1032_v13  ;;  %1789 = vmatprep.subr.mxu1 %v1938_v0  ;;  %v1202_v13 = vld [vmem:[#allocation6 + $0x50] sm:$0xff] }
 0xae4   :  { %1859 = vtanh.f32 %v1033_v14  ;;  %v1201_v14 = vld [vmem:[#allocation6 + $0x48] sm:$0xff] }
 0xaf0   :  { %v1858_v15 = vpop.eup %1857 }
 0xaf1   :  { %v1860_v16 = vpop.eup %1859  ;;  %v1036_v17 = vmul.f32 %v1858_v15, %v2136_v40  ;;  %v1200_v15 = vld [vmem:[#allocation6 + $0x40] sm:$0xff] }
 0xaf2   :  { %v1037_v18 = vmul.f32 %v1860_v16, %v2136_v40  ;;  %v1078_v40 = vld [vmem:[#allocation6 + $0x130] sm:$0xff]  ;;  %v1199_v16 = vld [vmem:[#allocation6 + $0x38] sm:$0xff] }
 0xaf3   :  { %v1038_v19 = vadd.f32 %v1036_v17, %v2140_v44  ;;  %1790 = vmatpush3.msra.mxu1 %v1078_v40  ;;  %v1198_v17 = vld [vmem:[#allocation6 + $0x30] sm:$0xff] }
 0xaf4   :  { %v1039_v20 = vadd.f32 %v1037_v18, %v2140_v44  ;;  %1791 = vmatprep.subr.mxu1 %v1938_v0  ;;  %v1077_v44 = vld [vmem:[#allocation6 + $0x120] sm:$0xff]  ;;  %v1197_v18 = vld [vmem:[#allocation6 + $0x28] sm:$0xff] }
 0xaf5   :  { %v1042_v21 = vrot.slane %v1038_v19, 7  ;;  %1792 = vmatpush3.msra.mxu1 %v1077_v44 }
 0xaf6   :  { %v1043_v22 = vrot.slane %v1039_v20, 6  ;;  %1793 = vmatprep.subr.mxu1 %v1938_v0 }
 0xaf7   :  { %1794 = vmatpush3.msra.mxu1 %v1076_v51 }
 0xaf8   :  { %v1044_v50 = vsel %vm265_vm5, %v1043_v22, %v1042_v21  ;;  %v1194_v21 = vld [vmem:[#allocation6 + $0x10] sm:$0xff]  ;;  %v1193_v22 = vld [vmem:[#allocation6 + $0x8] sm:$0xff] }
 0xaf9   :  { %1046 = vrot.lane.b32.xlu0 %v1044_v50, %s1943_s11  ;;  %1048 = vrot.lane.b32.xlu1 %v1044_v50, %s1942_s4 }
 0xafd   :  { %1050 = vrot.lane.b32.xlu0 %v1044_v50, %s1941_s1  ;;  %1072 = vperm.xlu1 %1813, %v1069_v30   ;;  %v1192_v50 = vld [vmem:[#allocation6] sm:$0xff] }
 0xb01   :  { %1176 = vrot.lane.b32.xlu1 %v2430_v60, %s1941_s1 }
 0xb6b   :  { %v1049_v0 = vpop.permute.xlu1 %1048  ;;  %v1047_v63 = vpop.permute.xlu0 %1046 }
 0xb6c   :  { %v1054_v61 = vrot.slane %v1049_v0, 1  ;;  %v1055_v62 = vrot.slane %v1049_v0, 2  ;;  %v1052_v6 = vmul.f32 %v1047_v63, %v954_v47  ;;  %v1211_v47 = vld [vmem:[#allocation6 + $0x98] sm:$0xff]  ;;  %v1227_v0 = vld [vmem:[#allocation6 + $0x101] ss:$8 sm:$0x3] }
 0xb6d   :  { %1251 = vmatprep.subr.mxu0 %v1211_v47 }
 0xb6e   :  { %v1058_v1 = vmul.f32 %v1054_v61, %v1038_v19  ;;  %v1059_v2 = vmul.f32 %v1055_v62, %v1039_v20  ;;  %1252 = vmatpush1.msra.mxu0 %v1210_v48  ;;  %v1196_v19 = vld [vmem:[#allocation6 + $0x20] sm:$0xff]  ;;  %v1195_v20 = vld [vmem:[#allocation6 + $0x18] sm:$0xff]  ;;  %v1236_v61 = vrot.slane %v1225_v58, %v1235_v59 }
 0xb6f   :  { %v1051_v27 = vpop.permute.xlu0 %1050  ;;  %1253 = vmatprep.subr.mxu0 %v1209_v49 }
 0xb70   :  { %v1062_v3 = vrot.slane %v1058_v1, 7  ;;  %v1063_v4 = vrot.slane %v1059_v2, 6  ;;  %1254 = vmatpush1.msra.mxu0 %v1208_v5  ;;  %v1316_v1 = vrot.slane %v1227_v0, %v2127_v25 }
 0xb71   :  { %1255 = vmatprep.subr.mxu0 %v1207_v7 }
 0xb72   :  { %v1064_v8 = vsel %vm265_vm5, %v1063_v4, %v1062_v3  ;;  %1256 = vmatpush1.msra.mxu0 %v1206_v9 }
 0xb73   :  { %v1066_v23 = vadd.f32 %v1064_v8, %v1052_v6  ;;  %1257 = vmatprep.subr.mxu0 %v1205_v10  ;;  %v1320_v6 = vrot.slane %v1227_v0, %v1235_v59 }
 0xb74   :  { %1258 = vmatpush1.msra.mxu0 %v1204_v11 }
 0xb75   :  { %1861 = vtanh.f32 %v1066_v23  ;;  %1259 = vmatprep.subr.mxu0 %v1203_v12 }
 0xb76   :  { %1260 = vmatpush1.msra.mxu0 %v1202_v13 }
 0xb77   :  { %1261 = vmatprep.subr.mxu0 %v1201_v14 }
 0xb78   :  { %v1073_v28 = vpop.permute.xlu1 %1072  ;;  %1262 = vmatpush1.msra.mxu0 %v1200_v15 }
 0xb79   :  { %1263 = vmatprep.subr.mxu0 %v1199_v16 }
 0xb7a   :  { %1264 = vmatpush1.msra.mxu0 %v1198_v17 }
 0xb7b   :  { %1265 = vmatprep.subr.mxu0 %v1197_v18 }
 0xb7c   :  { %1266 = vmatpush1.msra.mxu0 %v1196_v19  ;;  %v1177_v52 = vpop.permute.xlu1 %1176 }
 0xb7d   :  { %1267 = vmatprep.subr.mxu0 %v1195_v20 }
 0xb7e   :  { %1268 = vmatpush1.msra.mxu0 %v1194_v21 }
 0xb7f   :  { %1269 = vmatprep.subr.mxu0 %v1193_v22 }
 0xb80   :  { %1270 = vmatpush1.msra.mxu0 %v1192_v50 }
 0xb82   :  { %v1862_v26 = vpop.eup %1861 }
 0xb83   :  { %v1068_v29 = vmul.f32 %v1862_v26, %v1051_v27 }
 0xb85   :  { %v1075_v31 = vmul.f32 %v1073_v28, %v1068_v29 }
 0xb87   :  { %1796 = vmatmul.mubr.msk.f32.vlgmr.msra.gmra.mxu1 %vm75_vm1, %v1075_v31 }
 0xc47   :  { %v1149_v30 = vpop.f32.mrf.mxu1 }
 0xc48   :  { %v1173_v32 = vsub.f32 %v1149_v30, %v2430_v60  ;;  %v1175_v40 = vmul.f32 %v2430_v60, %v1149_v30  ;;  %v1187_v53 = vsel %vm75_vm1, %v1149_v30, %v1177_v52  ;;  %v1232_v60 = vrot.slane %v1225_v58, %v2127_v25 }
 0xc49   :  { %v1797_v44 = vpop.f32.mrf.mxu1 }
 0xc4a   :  { %1184 = vrot.lane.b32.xlu1 %v1175_v40, %s1943_s11  ;;  %v1174_v51 = vand.u32 2147483647, %v1173_v32 }
 0xc4c   :  { %1180 = vrot.lane.b32.xlu0 %v1174_v51, %s1942_s4 }
 0xcbc   :  { %v1185_v55 = vpop.permute.xlu1 %1184 }
 0xcbe   :  { %v1181_v54 = vpop.permute.xlu0 %1180 }
 0xcbf   :  { %v1189_v56 = vsel %vm1188_vm6, %v1187_v53, %v1181_v54 }
 0xcc0   :  { %v1191_v57 = vsel %vm1190_vm7, %v1189_v56, %v1185_v55 }
 0xcc1   :  { %1304 = vmatmul.mubr.f32.vlgmr.msra.gmra.mxu0 %v1191_v57 }
 0xd81   :  { %v1305_v62 = vpop.f32.mrf.mxu0 }
 0xd82   :  { %v1306_v63 = vadd.f32 %v1305_v62, %v1232_v60 }
 0xd83   :  { %v1307_v2 = vpop.f32.mrf.mxu0 }
 0xd84   :  { %v1310_v3 = vmax.f32 %v1306_v63, 0.0  ;;  %v1308_v4 = vadd.f32 %v1307_v2, %v1236_v61 }
 0xd86   :  { %v1323_v8 = vmul.f32 %v1316_v1, %v1310_v3  ;;  %v1311_v23 = vmax.f32 %v1308_v4, 0.0 }
 0xd88   :  { %v1324_v26 = vmul.f32 %v1320_v6, %v1311_v23  ;;  %v1326_v27 = vsel %vm1325_vm8, %v1323_v8, 0.0 }
 0xd8a   :  { %v1327_v28 = vsel %vm1325_vm8, %v1324_v26, 0.0 }
 0xd8b   :  { %v1328_v29 = vadd.f32 %v1327_v28, %v1326_v27 }
 0xd8d   :  { %1329 = vadd.xlane.f32.xlu0 %v1328_v29 }
 0xe16   :  { %v1330_v24 = vpop.xlane.xlu0 %1329 }
 0xe17   :  { %v1348_v31 = vmul.f32 -1.442695, %v1330_v24 }
 0xe19   :  { %1863 = vpow2.f32 %v1348_v31 }
 0xe26   :  { %v1864_v33 = vpop.eup %1863 }
 0xe27   :  { %v1334_v34 = vadd.f32 1.0, %v1864_v33 }
 0xe29   :  { %1865 = vrcp.f32 %v1334_v34 }
 0xe36   :  { %v1866_v25 = vpop.eup %1865 }
 0xe37   :  { %1338 = vst.msk [vmem:[%s2452_s5] sm:$0x3] %vm1337_vm9, %v1866_v25 }
 0xe38   :  { %1343 = vsyncpa [#allocation3], 1 }
 0xe39   :  { %1344 = vsyncpa [#allocation5], 1 }

</bundles_post_ra>
